<compile_context>
chip_gen: v7x
topology: tpu7x:2x2x1
jax: 0.10.0
libtpu: 0.0.40
codegen_flags: <defaults>
</compile_context>

<pallas_src>
import jax
import jax.numpy as jnp
from jax.experimental import pallas as pl
from jax.experimental.pallas import tpu as pltpu

IN_DIM = 28 * 28   # 784
HID_DIM = 28 * 28  # 784
OUT_DIM = 10


def _mlp_kernel(x_ref, w1_ref, b1_ref, w2_ref, b2_ref, out_ref):
    # x arrives f32 straight from HBM; cast to bf16 in-kernel (VPU work hidden
    # under MXU slack) instead of a separate wrapper-side XLA cast.
    x_bf = x_ref[...].astype(jnp.bfloat16)
    # layer 1: (TB, 784)bf16 @ (784, 784)bf16 -> f32 acc, + f32 bias
    h = jnp.dot(x_bf, w1_ref[...], preferred_element_type=jnp.float32)
    h = h + b1_ref[...]
    # layer 2: (TB, 784)bf16 @ (784, 10)bf16 -> f32 acc, + f32 bias
    o = jnp.dot(h.astype(jnp.bfloat16), w2_ref[...],
                preferred_element_type=jnp.float32)
    out_ref[...] = (o + b2_ref[...]).astype(out_ref.dtype)


def prepare_params(w1_t, b1, w2_t, b2):
    """One-time parameter prep (outside the per-call hot path).

    w1_t: (784, 784), w2_t: (784, 10) pre-transposed to (in, out).
    Returns bf16 weights and f32 (1, D) biases ready for mlp_forward.
    """
    return (w1_t.astype(jnp.bfloat16),
            b1.reshape(1, HID_DIM).astype(jnp.float32),
            w2_t.astype(jnp.bfloat16),
            b2.reshape(1, OUT_DIM).astype(jnp.float32))


def mlp_forward(x, w1_bf, b1_f32, w2_bf, b2_f32, *, tb=512):
    """x: (B, 784) f32; params from prepare_params.

    Returns (output f32 (B, 10), x) matching the PyTorch module's forward.
    """
    B = x.shape[0]

    if B <= tb:
        tb = B                      # single block; block == full dim is legal
    n_tiles = pl.cdiv(B, tb)        # boundary block (if any) is store-masked

    flops = 2 * B * IN_DIM * (HID_DIM + OUT_DIM)
    bytes_accessed = (B * IN_DIM * 4            # x (f32)
                      + IN_DIM * HID_DIM * 2    # W1 (bf16)
                      + HID_DIM * OUT_DIM * 2   # W2 (bf16)
                      + HID_DIM * 4 + OUT_DIM * 4  # biases (f32)
                      + B * OUT_DIM * 4)        # out (f32)

    out = pl.pallas_call(
        _mlp_kernel,
        out_shape=jax.ShapeDtypeStruct((B, OUT_DIM), jnp.float32),
        grid=(n_tiles,),
        in_specs=[
            pl.BlockSpec((tb, IN_DIM), lambda i: (i, 0)),        # x tile (pipelined)
            pl.BlockSpec((IN_DIM, HID_DIM), lambda i: (0, 0)),   # W1 resident
            pl.BlockSpec((1, HID_DIM), lambda i: (0, 0)),        # b1 resident
            pl.BlockSpec((HID_DIM, OUT_DIM), lambda i: (0, 0)),  # W2 resident
            pl.BlockSpec((1, OUT_DIM), lambda i: (0, 0)),        # b2 resident
        ],
        out_specs=pl.BlockSpec((tb, OUT_DIM), lambda i: (i, 0)),
        compiler_params=pltpu.CompilerParams(
            dimension_semantics=("parallel",),   # batch tiles are independent
        ),
        cost_estimate=pl.CostEstimate(
            flops=flops, transcendentals=0, bytes_accessed=bytes_accessed),
    )(x, w1_bf, b1_f32, w2_bf, b2_f32)

    return out, x


def init_params(key):
    """Deterministic synthetic f32 parameters with nn.Linear-like init."""
    k1, k2, k3, k4 = jax.random.split(key, 4)
    bound1 = 1.0 / (IN_DIM ** 0.5)
    bound2 = 1.0 / (HID_DIM ** 0.5)
    # PyTorch weight shape is (out, in); store transposed (in, out) for the kernel.
    w1_t = jax.random.uniform(k1, (IN_DIM, HID_DIM), jnp.float32, -bound1, bound1)
    b1 = jax.random.uniform(k2, (HID_DIM,), jnp.float32, -bound1, bound1)
    w2_t = jax.random.uniform(k3, (HID_DIM, OUT_DIM), jnp.float32, -bound2, bound2)
    b2 = jax.random.uniform(k4, (OUT_DIM,), jnp.float32, -bound2, bound2)
    return w1_t, b1, w2_t, b2


def _reference(x, w1_bf, b1_f32, w2_bf, b2_f32):
    """Pure-JAX reference with the same bf16-operand / f32-accumulate recipe."""
    h = jnp.dot(x.astype(jnp.bfloat16), w1_bf,
                preferred_element_type=jnp.float32) + b1_f32
    return jnp.dot(h.astype(jnp.bfloat16), w2_bf,
                   preferred_element_type=jnp.float32) + b2_f32


if __name__ == "__main__":
    key = jax.random.PRNGKey(0)
    kx, kx2, kp = jax.random.split(key, 3)

    w1_t, b1, w2_t, b2 = init_params(kp)
    w1_bf, b1_f32, w2_bf, b2_f32 = prepare_params(w1_t, b1, w2_t, b2)  # cast once

    # --- case 1: tiny batch (non-multiple of 8) -> single full-extent block ---
    B = 4
    x = jax.random.normal(kx, (B, IN_DIM), jnp.float32)
    out, x_echo = mlp_forward(x, w1_bf, b1_f32, w2_bf, b2_f32)
    jax.block_until_ready((out, x_echo))

    ref = _reference(x, w1_bf, b1_f32, w2_bf, b2_f32)
    ref_f32 = (x @ w1_t + b1) @ w2_t + b2  # coarse sanity check on bf16 path
    assert out.shape == (B, OUT_DIM)
    assert x_echo.shape == (B, IN_DIM)
    assert jnp.allclose(out, ref, atol=2e-2, rtol=2e-2)
    assert jnp.allclose(out, ref_f32, atol=5e-2, rtol=5e-2)
    assert jnp.array_equal(x_echo, x)

    # --- case 2: multi-tile grid with a partial boundary block (masked stores) ---
    B2, tb2 = 20, 8
    x2 = jax.random.normal(kx2, (B2, IN_DIM), jnp.float32)
    out2, x2_echo = mlp_forward(x2, w1_bf, b1_f32, w2_bf, b2_f32, tb=tb2)
    jax.block_until_ready((out2, x2_echo))

    ref2 = _reference(x2, w1_bf, b1_f32, w2_bf, b2_f32)
    assert out2.shape == (B2, OUT_DIM)
    assert jnp.allclose(out2, ref2, atol=2e-2, rtol=2e-2)
    assert jnp.array_equal(x2_echo, x2)

    print("KERNEL_OK")
</pallas_src>

<mosaic_0001>
module attributes {stable_mosaic.version = 11 : i64} {
  func.func @_mlp_kernel(%arg0: i32, %arg1: memref<4x784xf32, #tpu.memory_space<vmem>>, %arg2: memref<784x784xbf16, #tpu.memory_space<vmem>>, %arg3: memref<1x784xf32, #tpu.memory_space<vmem>>, %arg4: memref<784x10xbf16, #tpu.memory_space<vmem>>, %arg5: memref<1x10xf32, #tpu.memory_space<vmem>>, %arg6: memref<4x10xf32, #tpu.memory_space<vmem>>) attributes {dimension_semantics = [#tpu.dimension_semantics<parallel>], iteration_bounds = array<i64: 1>, scalar_prefetch = 0 : i64, scratch_operands = 0 : i64, tpu.core_type = #tpu.core_type<tc>, window_params = [{transform_indices = @transform_0, window_bounds = array<i64: 4, 784>}, {pipeline_mode = #tpu.pipeline_mode<synchronous>, transform_indices = @transform_1, window_bounds = array<i64: 784, 784>}, {pipeline_mode = #tpu.pipeline_mode<synchronous>, transform_indices = @transform_2, window_bounds = array<i64: 1, 784>}, {pipeline_mode = #tpu.pipeline_mode<synchronous>, transform_indices = @transform_3, window_bounds = array<i64: 784, 10>}, {pipeline_mode = #tpu.pipeline_mode<synchronous>, transform_indices = @transform_4, window_bounds = array<i64: 1, 10>}, {transform_indices = @transform_5, window_bounds = array<i64: 4, 10>}]} {
    %c0 = arith.constant 0 : index
    %c0_0 = arith.constant 0 : index
    %0 = vector.load %arg1[%c0, %c0_0] : memref<4x784xf32, #tpu.memory_space<vmem>>, vector<4x784xf32>
    %1 = arith.truncf %0 : vector<4x784xf32> to vector<4x784xbf16>
    %c0_1 = arith.constant 0 : index
    %c0_2 = arith.constant 0 : index
    %2 = vector.load %arg2[%c0_1, %c0_2] : memref<784x784xbf16, #tpu.memory_space<vmem>>, vector<784x784xbf16>
    %cst = arith.constant dense<0.000000e+00> : vector<4x784xf32>
    %3 = tpu.matmul %1, %2, %cst {dimension_numbers = #tpu.dot_dimension_numbers<[1], [0], [0], [1], [0, 0, 1, 1], [], []>} : vector<4x784xbf16>, vector<784x784xbf16>, vector<4x784xf32> -> vector<4x784xf32>
    %c0_3 = arith.constant 0 : index
    %c0_4 = arith.constant 0 : index
    %4 = vector.load %arg3[%c0_3, %c0_4] : memref<1x784xf32, #tpu.memory_space<vmem>>, vector<1x784xf32>
    %5 = vector.broadcast %4 : vector<1x784xf32> to vector<4x784xf32>
    %6 = arith.addf %3, %5 : vector<4x784xf32>
    %7 = arith.truncf %6 : vector<4x784xf32> to vector<4x784xbf16>
    %c0_5 = arith.constant 0 : index
    %c0_6 = arith.constant 0 : index
    %8 = vector.load %arg4[%c0_5, %c0_6] : memref<784x10xbf16, #tpu.memory_space<vmem>>, vector<784x10xbf16>
    %cst_7 = arith.constant dense<0.000000e+00> : vector<4x10xf32>
    %9 = tpu.matmul %7, %8, %cst_7 {dimension_numbers = #tpu.dot_dimension_numbers<[1], [0], [0], [1], [0, 0, 1, 1], [], []>} : vector<4x784xbf16>, vector<784x10xbf16>, vector<4x10xf32> -> vector<4x10xf32>
    %c0_8 = arith.constant 0 : index
    %c0_9 = arith.constant 0 : index
    %10 = vector.load %arg5[%c0_8, %c0_9] : memref<1x10xf32, #tpu.memory_space<vmem>>, vector<1x10xf32>
    %11 = vector.broadcast %10 : vector<1x10xf32> to vector<4x10xf32>
    %12 = arith.addf %9, %11 : vector<4x10xf32>
    %c0_10 = arith.constant 0 : index
    %c0_11 = arith.constant 0 : index
    %13 = vector.load %arg6[%c0_10, %c0_11] : memref<4x10xf32, #tpu.memory_space<vmem>>, vector<4x10xf32>
    tpu.vector_store %arg6[%c0_10, %c0_11], %12 {strides = array<i32>} : memref<4x10xf32, #tpu.memory_space<vmem>>, vector<4x10xf32>,
    return
  }
  func.func @transform_0(%arg0: i32) -> (i32, i32) {
    %c0_i32 = arith.constant 0 : i32
    %c0_i32_0 = arith.constant 0 : i32
    return %arg0, %c0_i32 : i32, i32
  }
  func.func @transform_1(%arg0: i32) -> (i32, i32) {
    %c0_i32 = arith.constant 0 : i32
    %c0_i32_0 = arith.constant 0 : i32
    %c0_i32_1 = arith.constant 0 : i32
    return %c0_i32, %c0_i32_0 : i32, i32
  }
  func.func @transform_2(%arg0: i32) -> (i32, i32) {
    %c0_i32 = arith.constant 0 : i32
    %c0_i32_0 = arith.constant 0 : i32
    %c0_i32_1 = arith.constant 0 : i32
    return %c0_i32, %c0_i32_0 : i32, i32
  }
  func.func @transform_3(%arg0: i32) -> (i32, i32) {
    %c0_i32 = arith.constant 0 : i32
    %c0_i32_0 = arith.constant 0 : i32
    %c0_i32_1 = arith.constant 0 : i32
    return %c0_i32, %c0_i32_0 : i32, i32
  }
  func.func @transform_4(%arg0: i32) -> (i32, i32) {
    %c0_i32 = arith.constant 0 : i32
    %c0_i32_0 = arith.constant 0 : i32
    %c0_i32_1 = arith.constant 0 : i32
    return %c0_i32, %c0_i32_0 : i32, i32
  }
  func.func @transform_5(%arg0: i32) -> (i32, i32) {
    %c0_i32 = arith.constant 0 : i32
    %c0_i32_0 = arith.constant 0 : i32
    return %arg0, %c0_i32 : i32, i32
  }
}

</mosaic_0001>

<bundles_post_ra>
// kernel: tpu_custom_call.1
= control target key start
LH: loop header
LB: loop body
LE: loop exit
PB: predicated region body
PF: predicated region fallthrough
CT: control target
= control target key end

     0   :  { %10 = vsyncpa [#allocation3], 0  ;;  %s5123_s0 = inlined_call_operand.hbm [shape: f32[4,784], index: 0, kind: input, shape index: {}]   ;;  %s5124_s1 = inlined_call_operand.hbm [shape: bf16[784,784], index: 1, kind: input, shape index: {}]   ;;  %s5125_s2 = inlined_call_operand.hbm [shape: f32[1,784], index: 2, kind: input, shape index: {}]   ;;  %s5126_s3 = inlined_call_operand.vmem [shape: bf16[784,10], index: 3, kind: input, shape index: {}]   ;;  %s5127_s4 = inlined_call_operand.hbm [shape: f32[1,10], index: 4, kind: input, shape index: {}]   ;;  %s5128_s5 = inlined_call_operand.hbm [shape: f32[4,10], index: 5, kind: output, shape index: {}]  }
   0x1   :  { %11 = vsyncpa [#allocation6], 0 }
   0x2   :  { %12 = vsyncpa [#allocation9], 0 }
   0x3   :  { %13 = vsyncpa [#allocation4], 0  ;;  %s4784_s18 = smov [#allocation5]   ;;  %s4666_s22 = scalar_lea.hbm %s5124_s1, 43904 }
   0x4   :  { %s29_s19 = sshll.u32 %s4784_s18, 4  ;;  %p4667_p0 = scmp.ne.s32.totalorder %s5124_s1, %s4666_s22  ;;  %s30_s19 = int_to_ptr.vmem [resolvable:$true] %s29_s19 }
   0x5   :  { %p4670_p1 = scmp.lt.u32.totalorder %s4666_s22, %s5124_s1 }
   0x7   :  { %p4672_p2 = pnand %p4670_p1, %p4667_p0 }
   0x9   :  { %4675 = shalt.err (!%p4672_p2)
}
   0xa   :  { %s4676_s27 = scalar_lea.vmem %s30_s19, 43904  ;;  %p4681_p4 = scmp.lt.s32.totalorder %s30_s19, %s30_s19 }
   0xb   :  { %p4677_p3 = scmp.ne.s32.totalorder %s30_s19, %s4676_s27  ;;  %p4682_p5 = scmp.lt.s32.totalorder %s4676_s27, %s4676_s27 }
   0xd   :  { %p4683_p6 = por %p4682_p5, %p4681_p4 }
   0xf   :  { %p4684_p7 = pnand %p4683_p6, %p4677_p3 }
  0x11   :  { %4687 = shalt.err (!%p4684_p7)
}
  0x12   :  { %s4785_s28 = smov 448   ;;  %s4786_s29 = smov 28  }
  0x13   :  { %35 = dma.hbm_to_vmem [thread:$0]  %s5124_s1, 43904, %s30_s19, [#allocation6], %s4785_s28, %s4785_s28, %s4786_s29  }
  0x14   :  { %s4787_s7 = smov [#allocation2]   ;;  %s4788_s9 = smov [#allocation7]  }
  0x15   :  { %s20_s8 = sshll.u32 %s4787_s7, 4  ;;  %s42_s10 = sshll.u32 %s4788_s9, 4  ;;  %s21_s8 = int_to_ptr.vmem [resolvable:$true] %s20_s8  ;;  %s43_s10 = int_to_ptr.vmem [resolvable:$true] %s42_s10 }
  0x16   :  { %s4688_s13 = scalar_lea.hbm %s5123_s0, 448 }
  0x17   :  { %p4689_p8 = scmp.ne.s32.totalorder %s5123_s0, %s4688_s13  ;;  %p4692_p9 = scmp.lt.u32.totalorder %s4688_s13, %s5123_s0 }
  0x19   :  { %p4694_p10 = pnand %p4692_p9, %p4689_p8 }
  0x1b   :  { %4697 = shalt.err (!%p4694_p10)
}
  0x1c   :  { %s4698_s1 = scalar_lea.vmem %s21_s8, 448  ;;  %p4703_p12 = scmp.lt.s32.totalorder %s21_s8, %s21_s8 }
  0x1d   :  { %p4699_p11 = scmp.ne.s32.totalorder %s21_s8, %s4698_s1  ;;  %p4704_p13 = scmp.lt.s32.totalorder %s4698_s1, %s4698_s1 }
  0x1f   :  { %p4705_p0 = por %p4704_p13, %p4703_p12 }
  0x21   :  { %p4706_p1 = pnand %p4705_p0, %p4699_p11 }
  0x23   :  { %4709 = shalt.err (!%p4706_p1)
}
  0x24   :  { %23 = dma.hbm_to_vmem [thread:$0]  %s5123_s0, 448, %s21_s8, [#allocation3]  }
  0x25   :  { %s4710_s22 = scalar_lea.hbm %s5125_s2, 112 }
  0x26   :  { %p4711_p2 = scmp.ne.s32.totalorder %s5125_s2, %s4710_s22  ;;  %p4714_p3 = scmp.lt.u32.totalorder %s4710_s22, %s5125_s2 }
  0x28   :  { %p4716_p4 = pnand %p4714_p3, %p4711_p2 }
  0x2a   :  { %4719 = shalt.err (!%p4716_p4)
}
  0x2b   :  { %s4720_s27 = scalar_lea.vmem %s43_s10, 112  ;;  %s4724_s28 = scalar_lea.vmem %s43_s10, 128 }
  0x2c   :  { %p4721_p5 = scmp.ne.s32.totalorder %s43_s10, %s4720_s27  ;;  %p4725_p6 = scmp.lt.s32.totalorder %s43_s10, %s43_s10 }
  0x2d   :  { %p4726_p7 = scmp.lt.s32.totalorder %s4724_s28, %s4720_s27 }
  0x2f   :  { %p4727_p8 = por %p4726_p7, %p4725_p6 }
  0x31   :  { %p4728_p9 = pnand %p4727_p8, %p4721_p5 }
  0x33   :  { %4731 = shalt.err (!%p4728_p9)
}
  0x34   :  { %45 = dma.hbm_to_vmem [thread:$0]  %s5125_s2, 112, %s43_s10, [#allocation6]  }
  0x35   :  { %s4789_s30 = smov [#allocation8]   ;;  %s4732_s9 = scalar_lea.hbm %s5127_s4, 16 }
  0x36   :  { %s54_s6 = sshll.u32 %s4789_s30, 4  ;;  %p4733_p10 = scmp.ne.s32.totalorder %s5127_s4, %s4732_s9  ;;  %s55_s6 = int_to_ptr.vmem [resolvable:$true] %s54_s6 }
  0x37   :  { %p4736_p11 = scmp.lt.u32.totalorder %s4732_s9, %s5127_s4 }
  0x39   :  { %p4738_p12 = pnand %p4736_p11, %p4733_p10 }
  0x3b   :  { %4741 = shalt.err (!%p4738_p12)
}
  0x3c   :  { %s4742_s15 = scalar_lea.vmem %s55_s6, 16  ;;  %s4746_s2 = scalar_lea.vmem %s55_s6, 32 }
  0x3d   :  { %p4743_p13 = scmp.ne.s32.totalorder %s55_s6, %s4742_s15  ;;  %p4747_p0 = scmp.lt.s32.totalorder %s55_s6, %s55_s6 }
  0x3e   :  { %p4748_p1 = scmp.lt.s32.totalorder %s4746_s2, %s4742_s15 }
  0x40   :  { %p4749_p2 = por %p4748_p1, %p4747_p0 }
  0x42   :  { %p4750_p3 = pnand %p4749_p2, %p4743_p13 }
  0x44   :  { %4753 = shalt.err (!%p4750_p3)
}
  0x45   :  { %57 = dma.hbm_to_vmem [thread:$0]  %s5127_s4, 16, %s55_s6, [#allocation9]  }
  0x46   :  { %4776 = dma.done.wait [#allocation3], 448  }
  0x47   :  { %4777 = vsyncadd [#allocation3], 4294966848 }
  0x48   :  { %4778 = dma.done.wait [#allocation6], 44016  }
  0x49   :  { %4779 = vsyncadd [#allocation6], 4294923280 }
  0x4a   :  { %4780 = dma.done.wait [#allocation9], 16  }
  0x4b   :  { %4781 = vsyncadd [#allocation9], 4294967280  ;;  %v4790_v0 = vmov 0   ;;  %v4124_v1 = vld [vmem:[#allocation5 + $0x4] ss:$28 sps:$4 sm:$0xff]   ;;  %vm2284_vm0 = vcmask 130048  }
  0x4c   :  { %2443 = vmatprep.mubr.bf16.mxu1 %v4790_v0  ;;  %v4126_v2 = vld [vmem:[#allocation5 + $0xa84] ss:$28 sps:$4 sm:$0xff]   ;;  %2288 = vmatprep.subr.bf16.mxu0 %v4124_v1  ;;  %v4130_v5 = vld [vmem:[#allocation5 + $0x3c] ss:$28 sps:$4 sm:$0xff]   ;;  %v4134_v7 = vld [vmem:[#allocation5 + $0xc] ss:$28 sps:$4 sm:$0xff]  }
  0x4d   :  { %v4128_v3 = vld [vmem:[#allocation5] ss:$28 sps:$4 sm:$0xff]   ;;  %2411 = vmatprep.subr.bf16.mxu1 %v4126_v2  ;;  %v4132_v6 = vld [vmem:[#allocation5 + $0x8] ss:$28 sps:$4 sm:$0xff]   ;;  %v4135_v8 = vld [vmem:[#allocation5 + $0x38] ss:$28 sps:$4 sm:$0xff]  }
  0x4e   :  { %v4129_v4 = vld [vmem:[#allocation5 + $0xa80] ss:$28 sps:$4 sm:$0xff]   ;;  %2289 = vmatpush1.bf16.msra.mxu0 %v4128_v3  ;;  %v4136_v11 = vld [vmem:[#allocation5 + $0x74] ss:$28 sps:$4 sm:$0xff]   ;;  %v4142_v15 = vld [vmem:[#allocation5 + $0xac] ss:$28 sps:$4 sm:$0xff]  }
  0x4f   :  { %2412 = vmatpush1.bf16.msra.mxu1 %v4129_v4  ;;  %2290 = vmatprep.subr.bf16.mxu0 %v4130_v5  ;;  %v74_v9 = vld [vmem:[#allocation2 + $0x18] sm:$0xf]  ;;  %v4140_v13 = vld [vmem:[#allocation5 + $0x44] ss:$28 sps:$4 sm:$0xff]   ;;  %v4141_v14 = vld [vmem:[#allocation5 + $0x70] ss:$28 sps:$4 sm:$0xff]  }
  0x50   :  { %2452 = vmatprep.subr.bf16.mxu1 %v4134_v7  ;;  %v4873_v10 = vpack.c.bf16 %v74_v9, %v74_v9  ;;  %v4138_v12 = vld [vmem:[#allocation5 + $0x40] ss:$28 sps:$4 sm:$0xff]   ;;  %v4147_v17 = vld [vmem:[#allocation5 + $0xa8] ss:$28 sps:$4 sm:$0xff]   ;;  %v4144_v18 = vld [vmem:[#allocation5 + $0x78] ss:$28 sps:$4 sm:$0xff]  }
  0x51   :  { %v4146_v16 = vld [vmem:[#allocation5 + $0x7c] ss:$28 sps:$4 sm:$0xff]   ;;  %v4148_v19 = vld [vmem:[#allocation5 + $0xe4] ss:$28 sps:$4 sm:$0xff]   ;;  %v4152_v20 = vld [vmem:[#allocation5 + $0xb4] ss:$28 sps:$4 sm:$0xff]  }
  0x52   :  { %2291 = vmatpush1.bf16.msra.mxu0 %v4135_v8  ;;  %3871 = vmatmul.mubr.msk.bf16.vlgmr.msra.gmra.mrb[0].mxu1 %vm2284_vm0, %v4873_v10  ;;  %v4150_v21 = vld [vmem:[#allocation5 + $0xb0] ss:$28 sps:$4 sm:$0xff]   ;;  %v4153_v22 = vld [vmem:[#allocation5 + $0xe0] ss:$28 sps:$4 sm:$0xff]   ;;  %v4159_v25 = vld [vmem:[#allocation5 + $0x118] ss:$28 sps:$4 sm:$0xff]  }
  0x53   :  { %2453 = vmatpush1.bf16.msra.mxu1 %v4132_v6  ;;  %2292 = vmatprep.subr.bf16.mxu0 %v4136_v11  ;;  %v4154_v23 = vld [vmem:[#allocation5 + $0x11c] ss:$28 sps:$4 sm:$0xff]   ;;  %v4158_v24 = vld [vmem:[#allocation5 + $0xec] ss:$28 sps:$4 sm:$0xff]   ;;  %v4160_v27 = vld [vmem:[#allocation5 + $0x154] ss:$28 sps:$4 sm:$0xff]  }
  0x54   :  { %2454 = vmatprep.subr.bf16.mxu1 %v4140_v13  ;;  %v4156_v26 = vld [vmem:[#allocation5 + $0xe8] ss:$28 sps:$4 sm:$0xff]   ;;  %v4162_v29 = vld [vmem:[#allocation5 + $0x120] ss:$28 sps:$4 sm:$0xff]   ;;  %v4165_v30 = vld [vmem:[#allocation5 + $0x150] ss:$28 sps:$4 sm:$0xff]  }
  0x55   :  { %v4164_v28 = vld [vmem:[#allocation5 + $0x124] ss:$28 sps:$4 sm:$0xff]   ;;  %v4166_v31 = vld [vmem:[#allocation5 + $0x18c] ss:$28 sps:$4 sm:$0xff]   ;;  %v4170_v32 = vld [vmem:[#allocation5 + $0x15c] ss:$28 sps:$4 sm:$0xff]  }
  0x56   :  { %2293 = vmatpush1.bf16.msra.mxu0 %v4141_v14  ;;  %v4171_v33 = vld [vmem:[#allocation5 + $0x188] ss:$28 sps:$4 sm:$0xff]   ;;  %v4168_v34 = vld [vmem:[#allocation5 + $0x158] ss:$28 sps:$4 sm:$0xff]   ;;  %v4174_v37 = vld [vmem:[#allocation5 + $0x190] ss:$28 sps:$4 sm:$0xff]  }
  0x57   :  { %2455 = vmatpush1.bf16.msra.mxu1 %v4138_v12  ;;  %2294 = vmatprep.subr.bf16.mxu0 %v4142_v15  ;;  %v4172_v35 = vld [vmem:[#allocation5 + $0x1c4] ss:$28 sps:$4 sm:$0xff]   ;;  %v4176_v36 = vld [vmem:[#allocation5 + $0x194] ss:$28 sps:$4 sm:$0xff]   ;;  %v4178_v39 = vld [vmem:[#allocation5 + $0x1fc] ss:$28 sps:$4 sm:$0xff]  }
  0x58   :  { %2456 = vmatprep.subr.bf16.mxu1 %v4146_v16  ;;  %v4177_v38 = vld [vmem:[#allocation5 + $0x1c0] ss:$28 sps:$4 sm:$0xff]   ;;  %v4182_v40 = vld [vmem:[#allocation5 + $0x1cc] ss:$28 sps:$4 sm:$0xff]   ;;  %v4183_v41 = vld [vmem:[#allocation5 + $0x1f8] ss:$28 sps:$4 sm:$0xff]  }
  0x59   :  { %v4180_v42 = vld [vmem:[#allocation5 + $0x1c8] ss:$28 sps:$4 sm:$0xff]   ;;  %v4184_v43 = vld [vmem:[#allocation5 + $0x234] ss:$28 sps:$4 sm:$0xff]   ;;  %v4186_v45 = vld [vmem:[#allocation5 + $0x200] ss:$28 sps:$4 sm:$0xff]  }
  0x5a   :  { %2295 = vmatpush1.bf16.msra.mxu0 %v4147_v17  ;;  %v4188_v44 = vld [vmem:[#allocation5 + $0x204] ss:$28 sps:$4 sm:$0xff]   ;;  %v4189_v46 = vld [vmem:[#allocation5 + $0x230] ss:$28 sps:$4 sm:$0xff]   ;;  %v4194_v48 = vld [vmem:[#allocation5 + $0x23c] ss:$28 sps:$4 sm:$0xff]  }
  0x5b   :  { %2457 = vmatpush1.bf16.msra.mxu1 %v4144_v18  ;;  %2296 = vmatprep.subr.bf16.mxu0 %v4148_v19  ;;  %v4190_v47 = vld [vmem:[#allocation5 + $0x26c] ss:$28 sps:$4 sm:$0xff]   ;;  %v4192_v52 = vld [vmem:[#allocation5 + $0x238] ss:$28 sps:$4 sm:$0xff]   ;;  %v4196_v53 = vld [vmem:[#allocation5 + $0x2a4] ss:$28 sps:$4 sm:$0xff]  }
  0x5c   :  { %2458 = vmatprep.subr.bf16.mxu1 %v4152_v20  ;;  %v71_v49 = vld [vmem:[#allocation2] sm:$0xff]  ;;  %v4200_v54 = vld [vmem:[#allocation5 + $0x274] ss:$28 sps:$4 sm:$0xff]   ;;  %v4201_v56 = vld [vmem:[#allocation5 + $0x2a0] ss:$28 sps:$4 sm:$0xff]   ;;  %vm4792_vm1 = vmmov 0  }
  0x5d   :  { %v4195_v50 = vld [vmem:[#allocation5 + $0x268] ss:$28 sps:$4 sm:$0xff]   ;;  %v78_v51 = vcombine.high %v71_v49, %v71_v49  ;;  %v4198_v57 = vld [vmem:[#allocation5 + $0x270] ss:$28 sps:$4 sm:$0xff]   ;;  %v4202_v58 = vld [vmem:[#allocation5 + $0x2dc] ss:$28 sps:$4 sm:$0xff]   ;;  %v4881_v9 = vpack.c.bf16 %v71_v49, %v71_v49 }
  0x5e   :  { %2297 = vmatpush1.bf16.msra.mxu0 %v4153_v22  ;;  %v4206_v59 = vld [vmem:[#allocation5 + $0x2ac] ss:$28 sps:$4 sm:$0xff]   ;;  %v4207_v60 = vld [vmem:[#allocation5 + $0x2d8] ss:$28 sps:$4 sm:$0xff]   ;;  %v4212_v63 = vld [vmem:[#allocation5 + $0x2e4] ss:$28 sps:$4 sm:$0xff]  }
  0x5f   :  { %2459 = vmatpush1.bf16.msra.mxu1 %v4150_v21  ;;  %2298 = vmatprep.subr.bf16.mxu0 %v4154_v23  ;;  %v4877_v55 = vpack.c.bf16 %v78_v51, %v78_v51  ;;  %v4204_v61 = vld [vmem:[#allocation5 + $0x2a8] ss:$28 sps:$4 sm:$0xff]   ;;  %v4208_v62 = vld [vmem:[#allocation5 + $0x314] ss:$28 sps:$4 sm:$0xff]   ;;  %v4210_v2 = vld [vmem:[#allocation5 + $0x2e0] ss:$28 sps:$4 sm:$0xff]  }
  0x60   :  { %2460 = vmatprep.subr.bf16.mxu1 %v4158_v24  ;;  %v4213_v1 = vld [vmem:[#allocation5 + $0x310] ss:$28 sps:$4 sm:$0xff]   ;;  %v4218_v4 = vld [vmem:[#allocation5 + $0x31c] ss:$28 sps:$4 sm:$0xff]   ;;  %v4219_v5 = vld [vmem:[#allocation5 + $0x348] ss:$28 sps:$4 sm:$0xff]  }
  0x61   :  { %2320 = vmatprep.mubr.bf16.mxu0 %v4877_v55  ;;  %2484 = vmatprep.mubr.bf16.mxu1 %v4877_v55  ;;  %v4214_v3 = vld [vmem:[#allocation5 + $0x34c] ss:$28 sps:$4 sm:$0xff]   ;;  %v4216_v6 = vld [vmem:[#allocation5 + $0x318] ss:$28 sps:$4 sm:$0xff]   ;;  %v4223_v7 = vld [vmem:[#allocation5 + $0x384] ss:$28 sps:$4 sm:$0xff]  }
  0x62   :  { %2299 = vmatpush1.bf16.msra.mxu0 %v4159_v25  ;;  %v4226_v8 = vld [vmem:[#allocation5 + $0x354] ss:$28 sps:$4 sm:$0xff]   ;;  %v4221_v11 = vld [vmem:[#allocation5 + $0x380] ss:$28 sps:$4 sm:$0xff]   ;;  %v4232_v14 = vld [vmem:[#allocation5 + $0x38c] ss:$28 sps:$4 sm:$0xff]  }
  0x63   :  { %2461 = vmatpush1.bf16.msra.mxu1 %v4156_v26  ;;  %2300 = vmatprep.subr.bf16.mxu0 %v4160_v27  ;;  %v4224_v12 = vld [vmem:[#allocation5 + $0x350] ss:$28 sps:$4 sm:$0xff]   ;;  %v4229_v13 = vld [vmem:[#allocation5 + $0x3bc] ss:$28 sps:$4 sm:$0xff]   ;;  %v4230_v16 = vld [vmem:[#allocation5 + $0x388] ss:$28 sps:$4 sm:$0xff]  }
  0x64   :  { %2462 = vmatprep.subr.bf16.mxu1 %v4164_v28  ;;  %v4227_v15 = vld [vmem:[#allocation5 + $0x3b8] ss:$28 sps:$4 sm:$0xff]   ;;  %v4238_v18 = vld [vmem:[#allocation5 + $0x3c4] ss:$28 sps:$4 sm:$0xff]   ;;  %v4233_v19 = vld [vmem:[#allocation5 + $0x3f0] ss:$28 sps:$4 sm:$0xff]  }
  0x65   :  { %v4235_v17 = vld [vmem:[#allocation5 + $0x3f4] ss:$28 sps:$4 sm:$0xff]   ;;  %v4236_v20 = vld [vmem:[#allocation5 + $0x3c0] ss:$28 sps:$4 sm:$0xff]   ;;  %v4241_v21 = vld [vmem:[#allocation5 + $0x42c] ss:$28 sps:$4 sm:$0xff]  }
  0x66   :  { %2301 = vmatpush1.bf16.msra.mxu0 %v4165_v30  ;;  %v4244_v22 = vld [vmem:[#allocation5 + $0x3fc] ss:$28 sps:$4 sm:$0xff]   ;;  %v4239_v23 = vld [vmem:[#allocation5 + $0x428] ss:$28 sps:$4 sm:$0xff]   ;;  %v4250_v26 = vld [vmem:[#allocation5 + $0x434] ss:$28 sps:$4 sm:$0xff]  }
  0x67   :  { %2463 = vmatpush1.bf16.msra.mxu1 %v4162_v29  ;;  %2302 = vmatprep.subr.bf16.mxu0 %v4166_v31  ;;  %v4242_v24 = vld [vmem:[#allocation5 + $0x3f8] ss:$28 sps:$4 sm:$0xff]   ;;  %v4247_v25 = vld [vmem:[#allocation5 + $0x464] ss:$28 sps:$4 sm:$0xff]   ;;  %v4248_v28 = vld [vmem:[#allocation5 + $0x430] ss:$28 sps:$4 sm:$0xff]  }
  0x68   :  { %2464 = vmatprep.subr.bf16.mxu1 %v4170_v32  ;;  %v4245_v27 = vld [vmem:[#allocation5 + $0x460] ss:$28 sps:$4 sm:$0xff]   ;;  %v4256_v30 = vld [vmem:[#allocation5 + $0x46c] ss:$28 sps:$4 sm:$0xff]   ;;  %v4251_v31 = vld [vmem:[#allocation5 + $0x498] ss:$28 sps:$4 sm:$0xff]  }
  0x69   :  { %v4253_v29 = vld [vmem:[#allocation5 + $0x49c] ss:$28 sps:$4 sm:$0xff]   ;;  %v4254_v32 = vld [vmem:[#allocation5 + $0x468] ss:$28 sps:$4 sm:$0xff]   ;;  %vm3509_vm2 = vcmask 76800  }
  0x6a   :  { %2303 = vmatpush1.bf16.msra.mxu0 %v4171_v33  ;;  %v4259_v33 = vld [vmem:[#allocation5 + $0x4d4] ss:$28 sps:$4 sm:$0xff]   ;;  %v4280_v49 = vld [vmem:[#allocation5 + $0x54c] ss:$28 sps:$4 sm:$0xff]  }
  0x6b   :  { %2465 = vmatpush1.bf16.msra.mxu1 %v4168_v34  ;;  %2304 = vmatprep.subr.bf16.mxu0 %v4172_v35  ;;  %v4262_v34 = vld [vmem:[#allocation5 + $0x4a4] ss:$28 sps:$4 sm:$0xff]   ;;  %v4885_v35 = vld [vmem:[#allocation2 + $0x8] sm:$0xff] }
  0x6c   :  { %2466 = vmatprep.subr.bf16.mxu1 %v4176_v36  ;;  %v79_v36 = vcombine.high %v4885_v35, %v4885_v35  ;;  %v4278_v51 = vld [vmem:[#allocation5 + $0x548] ss:$28 sps:$4 sm:$0xff]  }
  0x6e   :  { %2305 = vmatpush1.bf16.msra.mxu0 %v4177_v38  ;;  %v4260_v38 = vld [vmem:[#allocation5 + $0x4a0] ss:$28 sps:$4 sm:$0xff]  }
  0x6f   :  { %2467 = vmatpush1.bf16.msra.mxu1 %v4174_v37  ;;  %2306 = vmatprep.subr.bf16.mxu0 %v4178_v39  ;;  %v4257_v37 = vld [vmem:[#allocation5 + $0x4d0] ss:$28 sps:$4 sm:$0xff]  }
  0x70   :  { %2468 = vmatprep.subr.bf16.mxu1 %v4182_v40  ;;  %v4265_v39 = vld [vmem:[#allocation5 + $0x50c] ss:$28 sps:$4 sm:$0xff]   ;;  %v4889_v40 = vpack.c.bf16 %v79_v36, %v79_v36  ;;  %v4344_v36 = vld [vmem:[#allocation5 + $0x7e4] ss:$28 sps:$4 sm:$0xff]  }
  0x72   :  { %2307 = vmatpush1.bf16.msra.mxu0 %v4183_v41  ;;  %v4268_v41 = vld [vmem:[#allocation5 + $0x4dc] ss:$28 sps:$4 sm:$0xff]  }
  0x73   :  { %2469 = vmatpush1.bf16.msra.mxu1 %v4180_v42  ;;  %2308 = vmatprep.subr.bf16.mxu0 %v4184_v43  ;;  %v4263_v42 = vld [vmem:[#allocation5 + $0x508] ss:$28 sps:$4 sm:$0xff]   ;;  %v4266_v43 = vld [vmem:[#allocation5 + $0x4d8] ss:$28 sps:$4 sm:$0xff]  }
  0x74   :  { %2470 = vmatprep.subr.bf16.mxu1 %v4188_v44  ;;  %v4271_v44 = vld [vmem:[#allocation5 + $0x544] ss:$28 sps:$4 sm:$0xff]  }
  0x76   :  { %2309 = vmatpush1.bf16.msra.mxu0 %v4189_v46  ;;  %v4269_v46 = vld [vmem:[#allocation5 + $0x540] ss:$28 sps:$4 sm:$0xff]  }
  0x77   :  { %2471 = vmatpush1.bf16.msra.mxu1 %v4186_v45  ;;  %2310 = vmatprep.subr.bf16.mxu0 %v4190_v47  ;;  %v4274_v45 = vld [vmem:[#allocation5 + $0x514] ss:$28 sps:$4 sm:$0xff]  }
  0x78   :  { %2472 = vmatprep.subr.bf16.mxu1 %v4194_v48  ;;  %v4272_v47 = vld [vmem:[#allocation5 + $0x510] ss:$28 sps:$4 sm:$0xff]   ;;  %v4277_v48 = vld [vmem:[#allocation5 + $0x57c] ss:$28 sps:$4 sm:$0xff]  }
  0x7a   :  { %2311 = vmatpush1.bf16.msra.mxu0 %v4195_v50  ;;  %v4275_v50 = vld [vmem:[#allocation5 + $0x578] ss:$28 sps:$4 sm:$0xff]  }
  0x7b   :  { %2473 = vmatpush1.bf16.msra.mxu1 %v4192_v52  ;;  %2312 = vmatprep.subr.bf16.mxu0 %v4196_v53  ;;  %v4283_v52 = vld [vmem:[#allocation5 + $0x5b4] ss:$28 sps:$4 sm:$0xff]   ;;  %v4286_v53 = vld [vmem:[#allocation5 + $0x584] ss:$28 sps:$4 sm:$0xff]  }
  0x7c   :  { %2474 = vmatprep.subr.bf16.mxu1 %v4200_v54  ;;  %v4281_v54 = vld [vmem:[#allocation5 + $0x5b0] ss:$28 sps:$4 sm:$0xff]  }
  0x7e   :  { %2313 = vmatpush1.bf16.msra.mxu0 %v4201_v56  ;;  %v4284_v56 = vld [vmem:[#allocation5 + $0x580] ss:$28 sps:$4 sm:$0xff]  }
  0x7f   :  { %2475 = vmatpush1.bf16.msra.mxu1 %v4198_v57  ;;  %2314 = vmatprep.subr.bf16.mxu0 %v4202_v58  ;;  %v4289_v57 = vld [vmem:[#allocation5 + $0x5ec] ss:$28 sps:$4 sm:$0xff]   ;;  %v4292_v58 = vld [vmem:[#allocation5 + $0x5bc] ss:$28 sps:$4 sm:$0xff]  }
  0x80   :  { %2476 = vmatprep.subr.bf16.mxu1 %v4206_v59  ;;  %v4287_v59 = vld [vmem:[#allocation5 + $0x5e8] ss:$28 sps:$4 sm:$0xff]  }
  0x82   :  { %2315 = vmatpush1.bf16.msra.mxu0 %v4207_v60  ;;  %v4290_v60 = vld [vmem:[#allocation5 + $0x5b8] ss:$28 sps:$4 sm:$0xff]  }
  0x83   :  { %2477 = vmatpush1.bf16.msra.mxu1 %v4204_v61  ;;  %2316 = vmatprep.subr.bf16.mxu0 %v4208_v62  ;;  %v4295_v61 = vld [vmem:[#allocation5 + $0x624] ss:$28 sps:$4 sm:$0xff]   ;;  %v4298_v62 = vld [vmem:[#allocation5 + $0x5f4] ss:$28 sps:$4 sm:$0xff]  }
  0x84   :  { %2478 = vmatprep.subr.bf16.mxu1 %v4212_v63  ;;  %v4293_v63 = vld [vmem:[#allocation5 + $0x620] ss:$28 sps:$4 sm:$0xff]  }
  0x86   :  { %2317 = vmatpush1.bf16.msra.mxu0 %v4213_v1  ;;  %v4296_v1 = vld [vmem:[#allocation5 + $0x5f0] ss:$28 sps:$4 sm:$0xff]  }
  0x87   :  { %2479 = vmatpush1.bf16.msra.mxu1 %v4210_v2  ;;  %2318 = vmatprep.subr.bf16.mxu0 %v4214_v3  ;;  %v4301_v2 = vld [vmem:[#allocation5 + $0x65c] ss:$28 sps:$4 sm:$0xff]   ;;  %v4304_v3 = vld [vmem:[#allocation5 + $0x62c] ss:$28 sps:$4 sm:$0xff]  }
  0x88   :  { %2480 = vmatprep.subr.bf16.mxu1 %v4218_v4  ;;  %v4299_v4 = vld [vmem:[#allocation5 + $0x658] ss:$28 sps:$4 sm:$0xff]  }
  0x8a   :  { %2319 = vmatpush1.bf16.msra.mxu0 %v4219_v5  ;;  %v4302_v5 = vld [vmem:[#allocation5 + $0x628] ss:$28 sps:$4 sm:$0xff]  }
  0x8b   :  { %2481 = vmatpush1.bf16.msra.mxu1 %v4216_v6  ;;  %2329 = vmatprep.subr.bf16.mxu0 %v4223_v7  ;;  %v4307_v6 = vld [vmem:[#allocation5 + $0x694] ss:$28 sps:$4 sm:$0xff]   ;;  %v4310_v7 = vld [vmem:[#allocation5 + $0x664] ss:$28 sps:$4 sm:$0xff]  }
  0x8c   :  { %2482 = vmatprep.subr.bf16.mxu1 %v4226_v8  ;;  %v4305_v8 = vld [vmem:[#allocation5 + $0x690] ss:$28 sps:$4 sm:$0xff]  }
  0x8d   :  { %2321 = vmatmul.mubr.bf16.vlgmr.msra.gmra.mrb[0].mxu0 %v4881_v9 }
  0x8e   :  { %2330 = vmatpush1.bf16.msra.mxu0 %v4221_v11  ;;  %2361 = vmatprep.mubr.bf16.mxu0 %v4889_v40  ;;  %v4308_v11 = vld [vmem:[#allocation5 + $0x660] ss:$28 sps:$4 sm:$0xff]  }
  0x8f   :  { %2483 = vmatpush1.bf16.msra.mxu1 %v4224_v12  ;;  %2331 = vmatprep.subr.bf16.mxu0 %v4229_v13  ;;  %v4313_v12 = vld [vmem:[#allocation5 + $0x6cc] ss:$28 sps:$4 sm:$0xff]   ;;  %v4316_v13 = vld [vmem:[#allocation5 + $0x69c] ss:$28 sps:$4 sm:$0xff]  }
  0x90   :  { %2493 = vmatprep.subr.bf16.mxu1 %v4232_v14  ;;  %v4311_v14 = vld [vmem:[#allocation5 + $0x6c8] ss:$28 sps:$4 sm:$0xff]  }
  0x92   :  { %2332 = vmatpush1.bf16.msra.mxu0 %v4227_v15  ;;  %2485 = vmatmul.mubr.bf16.vlgmr.msra.gmra.mrb[4].mxu1 %v4881_v9  ;;  %v4314_v15 = vld [vmem:[#allocation5 + $0x698] ss:$28 sps:$4 sm:$0xff]  }
  0x93   :  { %2494 = vmatpush1.bf16.msra.mxu1 %v4230_v16  ;;  %2333 = vmatprep.subr.bf16.mxu0 %v4235_v17  ;;  %v4320_v16 = vld [vmem:[#allocation5 + $0x704] ss:$28 sps:$4 sm:$0xff]   ;;  %v4323_v17 = vld [vmem:[#allocation5 + $0x6d4] ss:$28 sps:$4 sm:$0xff]  }
  0x94   :  { %2495 = vmatprep.subr.bf16.mxu1 %v4238_v18  ;;  %2525 = vmatprep.mubr.bf16.mxu1 %v4889_v40  ;;  %v4318_v18 = vld [vmem:[#allocation5 + $0x700] ss:$28 sps:$4 sm:$0xff]  }
  0x96   :  { %2334 = vmatpush1.bf16.msra.mxu0 %v4233_v19  ;;  %v4895_v19 = vpack.c.bf16 %v4885_v35, %v4885_v35  ;;  %v4339_v35 = vld [vmem:[#allocation5 + $0x778] ss:$28 sps:$4 sm:$0xff]  }
  0x97   :  { %2496 = vmatpush1.bf16.msra.mxu1 %v4236_v20  ;;  %2335 = vmatprep.subr.bf16.mxu0 %v4241_v21  ;;  %v4321_v20 = vld [vmem:[#allocation5 + $0x6d0] ss:$28 sps:$4 sm:$0xff]   ;;  %v4326_v21 = vld [vmem:[#allocation5 + $0x73c] ss:$28 sps:$4 sm:$0xff]  }
  0x98   :  { %2497 = vmatprep.subr.bf16.mxu1 %v4244_v22  ;;  %v4897_v22 = vld [vmem:[#allocation2 + $0x10] sm:$0xff] }
  0x9a   :  { %2336 = vmatpush1.bf16.msra.mxu0 %v4239_v23  ;;  %v4329_v23 = vld [vmem:[#allocation5 + $0x70c] ss:$28 sps:$4 sm:$0xff]  }
  0x9b   :  { %2498 = vmatpush1.bf16.msra.mxu1 %v4242_v24  ;;  %2337 = vmatprep.subr.bf16.mxu0 %v4247_v25  ;;  %v80_v24 = vcombine.high %v4897_v22, %v4897_v22  ;;  %v4324_v25 = vld [vmem:[#allocation5 + $0x738] ss:$28 sps:$4 sm:$0xff]  }
  0x9c   :  { %2499 = vmatprep.subr.bf16.mxu1 %v4250_v26  ;;  %v4327_v26 = vld [vmem:[#allocation5 + $0x708] ss:$28 sps:$4 sm:$0xff]  }
  0x9e   :  { %2338 = vmatpush1.bf16.msra.mxu0 %v4245_v27  ;;  %v4902_v27 = vpack.c.bf16 %v80_v24, %v80_v24  ;;  %v4413_v24 = vld [vmem:[#allocation5 + $0xa1c] ss:$28 sps:$4 sm:$0xff]  }
  0x9f   :  { %2500 = vmatpush1.bf16.msra.mxu1 %v4248_v28  ;;  %2339 = vmatprep.subr.bf16.mxu0 %v4253_v29  ;;  %v4332_v28 = vld [vmem:[#allocation5 + $0x774] ss:$28 sps:$4 sm:$0xff]   ;;  %v4335_v29 = vld [vmem:[#allocation5 + $0x744] ss:$28 sps:$4 sm:$0xff]  }
  0xa0   :  { %2501 = vmatprep.subr.bf16.mxu1 %v4256_v30  ;;  %v4330_v30 = vld [vmem:[#allocation5 + $0x770] ss:$28 sps:$4 sm:$0xff]  }
  0xa2   :  { %2340 = vmatpush1.bf16.msra.mxu0 %v4251_v31  ;;  %v4333_v31 = vld [vmem:[#allocation5 + $0x740] ss:$28 sps:$4 sm:$0xff]  }
  0xa3   :  { %2502 = vmatpush1.bf16.msra.mxu1 %v4254_v32  ;;  %2341 = vmatprep.subr.bf16.mxu0 %v4259_v33  ;;  %v4338_v32 = vld [vmem:[#allocation5 + $0x7ac] ss:$28 sps:$4 sm:$0xff]   ;;  %v4341_v33 = vld [vmem:[#allocation5 + $0x77c] ss:$28 sps:$4 sm:$0xff]  }
  0xa4   :  { %2503 = vmatprep.subr.bf16.mxu1 %v4262_v34  ;;  %v4336_v34 = vld [vmem:[#allocation5 + $0x7a8] ss:$28 sps:$4 sm:$0xff]  }
  0xa6   :  { %2342 = vmatpush1.bf16.msra.mxu0 %v4257_v37  ;;  %v4347_v37 = vld [vmem:[#allocation5 + $0x7b4] ss:$28 sps:$4 sm:$0xff]  }
  0xa7   :  { %2504 = vmatpush1.bf16.msra.mxu1 %v4260_v38  ;;  %2343 = vmatprep.subr.bf16.mxu0 %v4265_v39  ;;  %v4342_v38 = vld [vmem:[#allocation5 + $0x7e0] ss:$28 sps:$4 sm:$0xff]   ;;  %v4345_v39 = vld [vmem:[#allocation5 + $0x7b0] ss:$28 sps:$4 sm:$0xff]  }
  0xa8   :  { %2505 = vmatprep.subr.bf16.mxu1 %v4268_v41  ;;  %v4350_v41 = vld [vmem:[#allocation5 + $0x81c] ss:$28 sps:$4 sm:$0xff]  }
  0xaa   :  { %2344 = vmatpush1.bf16.msra.mxu0 %v4263_v42  ;;  %v4353_v42 = vld [vmem:[#allocation5 + $0x7ec] ss:$28 sps:$4 sm:$0xff]  }
  0xab   :  { %2506 = vmatpush1.bf16.msra.mxu1 %v4266_v43  ;;  %2345 = vmatprep.subr.bf16.mxu0 %v4271_v44  ;;  %v4348_v43 = vld [vmem:[#allocation5 + $0x818] ss:$28 sps:$4 sm:$0xff]   ;;  %v4351_v44 = vld [vmem:[#allocation5 + $0x7e8] ss:$28 sps:$4 sm:$0xff]  }
  0xac   :  { %2507 = vmatprep.subr.bf16.mxu1 %v4274_v45  ;;  %v4356_v45 = vld [vmem:[#allocation5 + $0x854] ss:$28 sps:$4 sm:$0xff]  }
  0xae   :  { %2346 = vmatpush1.bf16.msra.mxu0 %v4269_v46  ;;  %v4359_v46 = vld [vmem:[#allocation5 + $0x824] ss:$28 sps:$4 sm:$0xff]  }
  0xaf   :  { %2508 = vmatpush1.bf16.msra.mxu1 %v4272_v47  ;;  %2347 = vmatprep.subr.bf16.mxu0 %v4277_v48  ;;  %v4354_v47 = vld [vmem:[#allocation5 + $0x850] ss:$28 sps:$4 sm:$0xff]   ;;  %v4357_v48 = vld [vmem:[#allocation5 + $0x820] ss:$28 sps:$4 sm:$0xff]  }
  0xb0   :  { %2509 = vmatprep.subr.bf16.mxu1 %v4280_v49  ;;  %v4362_v49 = vld [vmem:[#allocation5 + $0x88c] ss:$28 sps:$4 sm:$0xff]  }
  0xb2   :  { %2348 = vmatpush1.bf16.msra.mxu0 %v4275_v50  ;;  %v4365_v50 = vld [vmem:[#allocation5 + $0x85c] ss:$28 sps:$4 sm:$0xff]  }
  0xb3   :  { %2510 = vmatpush1.bf16.msra.mxu1 %v4278_v51  ;;  %2349 = vmatprep.subr.bf16.mxu0 %v4283_v52  ;;  %v4360_v51 = vld [vmem:[#allocation5 + $0x888] ss:$28 sps:$4 sm:$0xff]   ;;  %v4363_v52 = vld [vmem:[#allocation5 + $0x858] ss:$28 sps:$4 sm:$0xff]  }
  0xb4   :  { %2511 = vmatprep.subr.bf16.mxu1 %v4286_v53  ;;  %v4368_v53 = vld [vmem:[#allocation5 + $0x8c4] ss:$28 sps:$4 sm:$0xff]  }
  0xb6   :  { %2350 = vmatpush1.bf16.msra.mxu0 %v4281_v54  ;;  %v4371_v54 = vld [vmem:[#allocation5 + $0x894] ss:$28 sps:$4 sm:$0xff]  }
  0xb7   :  { %2512 = vmatpush1.bf16.msra.mxu1 %v4284_v56  ;;  %2351 = vmatprep.subr.bf16.mxu0 %v4289_v57  ;;  %v4366_v56 = vld [vmem:[#allocation5 + $0x8c0] ss:$28 sps:$4 sm:$0xff]   ;;  %v4369_v57 = vld [vmem:[#allocation5 + $0x890] ss:$28 sps:$4 sm:$0xff]  }
  0xb8   :  { %2513 = vmatprep.subr.bf16.mxu1 %v4292_v58  ;;  %v4374_v58 = vld [vmem:[#allocation5 + $0x8fc] ss:$28 sps:$4 sm:$0xff]  }
  0xba   :  { %2352 = vmatpush1.bf16.msra.mxu0 %v4287_v59  ;;  %v4377_v59 = vld [vmem:[#allocation5 + $0x8cc] ss:$28 sps:$4 sm:$0xff]  }
  0xbb   :  { %2514 = vmatpush1.bf16.msra.mxu1 %v4290_v60  ;;  %2353 = vmatprep.subr.bf16.mxu0 %v4295_v61  ;;  %v4372_v60 = vld [vmem:[#allocation5 + $0x8f8] ss:$28 sps:$4 sm:$0xff]   ;;  %v4375_v61 = vld [vmem:[#allocation5 + $0x8c8] ss:$28 sps:$4 sm:$0xff]  }
  0xbc   :  { %2515 = vmatprep.subr.bf16.mxu1 %v4298_v62  ;;  %v4380_v62 = vld [vmem:[#allocation5 + $0x934] ss:$28 sps:$4 sm:$0xff]  }
  0xbe   :  { %2354 = vmatpush1.bf16.msra.mxu0 %v4293_v63  ;;  %v4383_v63 = vld [vmem:[#allocation5 + $0x904] ss:$28 sps:$4 sm:$0xff]  }
  0xbf   :  { %2516 = vmatpush1.bf16.msra.mxu1 %v4296_v1  ;;  %2355 = vmatprep.subr.bf16.mxu0 %v4301_v2  ;;  %v4378_v1 = vld [vmem:[#allocation5 + $0x930] ss:$28 sps:$4 sm:$0xff]   ;;  %v4381_v2 = vld [vmem:[#allocation5 + $0x900] ss:$28 sps:$4 sm:$0xff]  }
  0xc0   :  { %2517 = vmatprep.subr.bf16.mxu1 %v4304_v3  ;;  %v4386_v3 = vld [vmem:[#allocation5 + $0x96c] ss:$28 sps:$4 sm:$0xff]  }
  0xc2   :  { %2356 = vmatpush1.bf16.msra.mxu0 %v4299_v4  ;;  %v4389_v4 = vld [vmem:[#allocation5 + $0x93c] ss:$28 sps:$4 sm:$0xff]  }
  0xc3   :  { %2518 = vmatpush1.bf16.msra.mxu1 %v4302_v5  ;;  %2357 = vmatprep.subr.bf16.mxu0 %v4307_v6  ;;  %v4384_v5 = vld [vmem:[#allocation5 + $0x968] ss:$28 sps:$4 sm:$0xff]   ;;  %v4387_v6 = vld [vmem:[#allocation5 + $0x938] ss:$28 sps:$4 sm:$0xff]  }
  0xc4   :  { %2519 = vmatprep.subr.bf16.mxu1 %v4310_v7  ;;  %v4392_v7 = vld [vmem:[#allocation5 + $0x9a4] ss:$28 sps:$4 sm:$0xff]  }
  0xc6   :  { %2358 = vmatpush1.bf16.msra.mxu0 %v4305_v8  ;;  %v4395_v8 = vld [vmem:[#allocation5 + $0x974] ss:$28 sps:$4 sm:$0xff]  }
  0xc7   :  { %2520 = vmatpush1.bf16.msra.mxu1 %v4308_v11  ;;  %2359 = vmatprep.subr.bf16.mxu0 %v4313_v12  ;;  %v4390_v11 = vld [vmem:[#allocation5 + $0x9a0] ss:$28 sps:$4 sm:$0xff]   ;;  %v4393_v12 = vld [vmem:[#allocation5 + $0x970] ss:$28 sps:$4 sm:$0xff]  }
  0xc8   :  { %2521 = vmatprep.subr.bf16.mxu1 %v4316_v13  ;;  %v4398_v13 = vld [vmem:[#allocation5 + $0x9dc] ss:$28 sps:$4 sm:$0xff]  }
  0xca   :  { %2360 = vmatpush1.bf16.msra.mxu0 %v4311_v14  ;;  %v4401_v14 = vld [vmem:[#allocation5 + $0x9ac] ss:$28 sps:$4 sm:$0xff]  }
  0xcb   :  { %2522 = vmatpush1.bf16.msra.mxu1 %v4314_v15  ;;  %2370 = vmatprep.subr.bf16.mxu0 %v4320_v16  ;;  %v4396_v15 = vld [vmem:[#allocation5 + $0x9d8] ss:$28 sps:$4 sm:$0xff]   ;;  %v4399_v16 = vld [vmem:[#allocation5 + $0x9a8] ss:$28 sps:$4 sm:$0xff]  }
  0xcc   :  { %2523 = vmatprep.subr.bf16.mxu1 %v4323_v17  ;;  %v4404_v17 = vld [vmem:[#allocation5 + $0xa14] ss:$28 sps:$4 sm:$0xff]  }
  0xcd   :  { %2362 = vmatmul.mubr.bf16.vlgmr.msra.gmra.mrb[0].mxu0 %v4895_v19 }
  0xce   :  { %2371 = vmatpush1.bf16.msra.mxu0 %v4318_v18  ;;  %2402 = vmatprep.mubr.bf16.mxu0 %v4902_v27  ;;  %v4407_v18 = vld [vmem:[#allocation5 + $0x9e4] ss:$28 sps:$4 sm:$0xff]  }
  0xcf   :  { %2524 = vmatpush1.bf16.msra.mxu1 %v4321_v20  ;;  %2372 = vmatprep.subr.bf16.mxu0 %v4326_v21  ;;  %v4402_v20 = vld [vmem:[#allocation5 + $0xa10] ss:$28 sps:$4 sm:$0xff]   ;;  %v4405_v21 = vld [vmem:[#allocation5 + $0x9e0] ss:$28 sps:$4 sm:$0xff]  }
  0xd0   :  { %2534 = vmatprep.subr.bf16.mxu1 %v4329_v23  ;;  %v4410_v23 = vld [vmem:[#allocation5 + $0xa4c] ss:$28 sps:$4 sm:$0xff]  }
  0xd2   :  { %2373 = vmatpush1.bf16.msra.mxu0 %v4324_v25  ;;  %2526 = vmatmul.mubr.bf16.vlgmr.msra.gmra.mrb[4].mxu1 %v4895_v19  ;;  %v4408_v25 = vld [vmem:[#allocation5 + $0xa48] ss:$28 sps:$4 sm:$0xff]  }
  0xd3   :  { %2535 = vmatpush1.bf16.msra.mxu1 %v4327_v26  ;;  %2374 = vmatprep.subr.bf16.mxu0 %v4332_v28  ;;  %v4411_v26 = vld [vmem:[#allocation5 + $0xa18] ss:$28 sps:$4 sm:$0xff]  }
  0xd4   :  { %2536 = vmatprep.subr.bf16.mxu1 %v4335_v29  ;;  %2566 = vmatprep.mubr.bf16.mxu1 %v4902_v27  ;;  %v4420_v28 = vld [vmem:[#allocation5 + $0x14] ss:$28 sps:$4 sm:$0xff]  }
  0xd5   :  { %v4417_v29 = vld [vmem:[#allocation5 + $0xa54] ss:$28 sps:$4 sm:$0xff]  }
  0xd6   :  { %2375 = vmatpush1.bf16.msra.mxu0 %v4330_v30  ;;  %v4909_v30 = vpack.c.bf16 %v4897_v22, %v4897_v22  ;;  %v4454_v22 = vld [vmem:[#allocation5 + $0x1d8] ss:$28 sps:$4 sm:$0xff]  }
  0xd7   :  { %2537 = vmatpush1.bf16.msra.mxu1 %v4333_v31  ;;  %2376 = vmatprep.subr.bf16.mxu0 %v4338_v32  ;;  %v4415_v31 = vld [vmem:[#allocation5 + $0xa50] ss:$28 sps:$4 sm:$0xff]  }
  0xd8   :  { %2538 = vmatprep.subr.bf16.mxu1 %v4341_v33  ;;  %v4418_v32 = vld [vmem:[#allocation5 + $0x10] ss:$28 sps:$4 sm:$0xff]  }
  0xd9   :  { %v4423_v33 = vld [vmem:[#allocation5 + $0x4c] ss:$28 sps:$4 sm:$0xff]  }
  0xda   :  { %2377 = vmatpush1.bf16.msra.mxu0 %v4336_v34  ;;  %v4429_v34 = vld [vmem:[#allocation5 + $0xa8c] ss:$28 sps:$4 sm:$0xff]  }
  0xdb   :  { %2539 = vmatpush1.bf16.msra.mxu1 %v4339_v35  ;;  %2378 = vmatprep.subr.bf16.mxu0 %v4344_v36  ;;  %v4421_v35 = vld [vmem:[#allocation5 + $0x48] ss:$28 sps:$4 sm:$0xff]  }
  0xdc   :  { %2540 = vmatprep.subr.bf16.mxu1 %v4347_v37  ;;  %v4426_v36 = vld [vmem:[#allocation5 + $0x84] ss:$28 sps:$4 sm:$0xff]  }
  0xdd   :  { %v4427_v37 = vld [vmem:[#allocation5 + $0xa88] ss:$28 sps:$4 sm:$0xff]  }
  0xde   :  { %2379 = vmatpush1.bf16.msra.mxu0 %v4342_v38  ;;  %v4424_v38 = vld [vmem:[#allocation5 + $0x80] ss:$28 sps:$4 sm:$0xff]  }
  0xdf   :  { %2541 = vmatpush1.bf16.msra.mxu1 %v4345_v39  ;;  %2380 = vmatprep.subr.bf16.mxu0 %v4350_v41  ;;  %v4432_v39 = vld [vmem:[#allocation5 + $0xbc] ss:$28 sps:$4 sm:$0xff]  }
  0xe0   :  { %2542 = vmatprep.subr.bf16.mxu1 %v4353_v42  ;;  %v4430_v41 = vld [vmem:[#allocation5 + $0xb8] ss:$28 sps:$4 sm:$0xff]  }
  0xe1   :  { %v4435_v42 = vld [vmem:[#allocation5 + $0xf4] ss:$28 sps:$4 sm:$0xff]  }
  0xe2   :  { %2381 = vmatpush1.bf16.msra.mxu0 %v4348_v43  ;;  %v4433_v43 = vld [vmem:[#allocation5 + $0xf0] ss:$28 sps:$4 sm:$0xff]  }
  0xe3   :  { %2543 = vmatpush1.bf16.msra.mxu1 %v4351_v44  ;;  %2382 = vmatprep.subr.bf16.mxu0 %v4356_v45  ;;  %v4438_v44 = vld [vmem:[#allocation5 + $0x12c] ss:$28 sps:$4 sm:$0xff]   ;;  %v4455_v45 = vld [vmem:[#allocation5 + $0x18] ss:$28 sps:$4 sm:$0xff]  }
  0xe4   :  { %2544 = vmatprep.subr.bf16.mxu1 %v4359_v46  ;;  %v4459_v46 = vld [vmem:[#allocation5 + $0x210] ss:$28 sps:$4 sm:$0xff]  }
  0xe6   :  { %2383 = vmatpush1.bf16.msra.mxu0 %v4354_v47  ;;  %v4436_v47 = vld [vmem:[#allocation5 + $0x128] ss:$28 sps:$4 sm:$0xff]  }
  0xe7   :  { %2545 = vmatpush1.bf16.msra.mxu1 %v4357_v48  ;;  %2384 = vmatprep.subr.bf16.mxu0 %v4362_v49  ;;  %v4441_v48 = vld [vmem:[#allocation5 + $0x164] ss:$28 sps:$4 sm:$0xff]   ;;  %v4460_v49 = vld [vmem:[#allocation5 + $0x50] ss:$28 sps:$4 sm:$0xff]  }
  0xe8   :  { %2546 = vmatprep.subr.bf16.mxu1 %v4365_v50  ;;  %v4464_v50 = vld [vmem:[#allocation5 + $0x248] ss:$28 sps:$4 sm:$0xff]  }
  0xea   :  { %2385 = vmatpush1.bf16.msra.mxu0 %v4360_v51  ;;  %v4439_v51 = vld [vmem:[#allocation5 + $0x160] ss:$28 sps:$4 sm:$0xff]  }
  0xeb   :  { %2547 = vmatpush1.bf16.msra.mxu1 %v4363_v52  ;;  %2386 = vmatprep.subr.bf16.mxu0 %v4368_v53  ;;  %v4444_v52 = vld [vmem:[#allocation5 + $0x19c] ss:$28 sps:$4 sm:$0xff]   ;;  %v4465_v53 = vld [vmem:[#allocation5 + $0x88] ss:$28 sps:$4 sm:$0xff]  }
  0xec   :  { %2548 = vmatprep.subr.bf16.mxu1 %v4371_v54  ;;  %v4469_v54 = vld [vmem:[#allocation5 + $0x280] ss:$28 sps:$4 sm:$0xff]  }
  0xee   :  { %2387 = vmatpush1.bf16.msra.mxu0 %v4366_v56  ;;  %v4442_v56 = vld [vmem:[#allocation5 + $0x198] ss:$28 sps:$4 sm:$0xff]  }
  0xef   :  { %2549 = vmatpush1.bf16.msra.mxu1 %v4369_v57  ;;  %2388 = vmatprep.subr.bf16.mxu0 %v4374_v58  ;;  %v4447_v57 = vld [vmem:[#allocation5 + $0x1d4] ss:$28 sps:$4 sm:$0xff]  }
  0xf0   :  { %2550 = vmatprep.subr.bf16.mxu1 %v4377_v59 }
  0xf2   :  { %2389 = vmatpush1.bf16.msra.mxu0 %v4372_v60  ;;  %v4470_v60 = vld [vmem:[#allocation5 + $0xc0] ss:$28 sps:$4 sm:$0xff]  }
  0xf3   :  { %2551 = vmatpush1.bf16.msra.mxu1 %v4375_v61  ;;  %2390 = vmatprep.subr.bf16.mxu0 %v4380_v62 }
  0xf4   :  { %2552 = vmatprep.subr.bf16.mxu1 %v4383_v63  ;;  %v4445_v63 = vld [vmem:[#allocation5 + $0x1d0] ss:$28 sps:$4 sm:$0xff]  }
  0xf6   :  { %2391 = vmatpush1.bf16.msra.mxu0 %v4378_v1  ;;  %v4450_v1 = vld [vmem:[#allocation5 + $0x20c] ss:$28 sps:$4 sm:$0xff]  }
  0xf7   :  { %2553 = vmatpush1.bf16.msra.mxu1 %v4381_v2  ;;  %2392 = vmatprep.subr.bf16.mxu0 %v4386_v3  ;;  %v4475_v2 = vld [vmem:[#allocation5 + $0xf8] ss:$28 sps:$4 sm:$0xff]   ;;  %v4479_v3 = vld [vmem:[#allocation5 + $0x2f0] ss:$28 sps:$4 sm:$0xff]  }
  0xf8   :  { %2554 = vmatprep.subr.bf16.mxu1 %v4389_v4  ;;  %v4448_v4 = vld [vmem:[#allocation5 + $0x208] ss:$28 sps:$4 sm:$0xff]  }
  0xfa   :  { %2393 = vmatpush1.bf16.msra.mxu0 %v4384_v5  ;;  %v4453_v5 = vld [vmem:[#allocation5 + $0x244] ss:$28 sps:$4 sm:$0xff]  }
  0xfb   :  { %2555 = vmatpush1.bf16.msra.mxu1 %v4387_v6  ;;  %2394 = vmatprep.subr.bf16.mxu0 %v4392_v7  ;;  %v4480_v6 = vld [vmem:[#allocation5 + $0x130] ss:$28 sps:$4 sm:$0xff]   ;;  %v4484_v7 = vld [vmem:[#allocation5 + $0x328] ss:$28 sps:$4 sm:$0xff]  }
  0xfc   :  { %2556 = vmatprep.subr.bf16.mxu1 %v4395_v8  ;;  %v4451_v8 = vld [vmem:[#allocation5 + $0x240] ss:$28 sps:$4 sm:$0xff]  }
  0xfe   :  { %2395 = vmatpush1.bf16.msra.mxu0 %v4390_v11  ;;  %v4458_v11 = vld [vmem:[#allocation5 + $0x27c] ss:$28 sps:$4 sm:$0xff]  }
  0xff   :  { %2557 = vmatpush1.bf16.msra.mxu1 %v4393_v12  ;;  %2396 = vmatprep.subr.bf16.mxu0 %v4398_v13  ;;  %v4485_v12 = vld [vmem:[#allocation5 + $0x168] ss:$28 sps:$4 sm:$0xff]   ;;  %v4489_v13 = vld [vmem:[#allocation5 + $0x360] ss:$28 sps:$4 sm:$0xff]  }
 0x100   :  { %2558 = vmatprep.subr.bf16.mxu1 %v4401_v14  ;;  %v4456_v14 = vld [vmem:[#allocation5 + $0x278] ss:$28 sps:$4 sm:$0xff]  }
 0x102   :  { %2397 = vmatpush1.bf16.msra.mxu0 %v4396_v15  ;;  %v4463_v15 = vld [vmem:[#allocation5 + $0x2b4] ss:$28 sps:$4 sm:$0xff]  }
 0x103   :  { %2559 = vmatpush1.bf16.msra.mxu1 %v4399_v16  ;;  %2398 = vmatprep.subr.bf16.mxu0 %v4404_v17  ;;  %v4490_v16 = vld [vmem:[#allocation5 + $0x1a0] ss:$28 sps:$4 sm:$0xff]   ;;  %v4494_v17 = vld [vmem:[#allocation5 + $0x558] ss:$28 sps:$4 sm:$0xff]  }
 0x104   :  { %2560 = vmatprep.subr.bf16.mxu1 %v4407_v18  ;;  %v4461_v18 = vld [vmem:[#allocation5 + $0x2b0] ss:$28 sps:$4 sm:$0xff]  }
 0x106   :  { %2399 = vmatpush1.bf16.msra.mxu0 %v4402_v20  ;;  %v4468_v20 = vld [vmem:[#allocation5 + $0x2ec] ss:$28 sps:$4 sm:$0xff]  }
 0x107   :  { %2561 = vmatpush1.bf16.msra.mxu1 %v4405_v21  ;;  %2400 = vmatprep.subr.bf16.mxu0 %v4410_v23  ;;  %v4495_v21 = vld [vmem:[#allocation5 + $0x398] ss:$28 sps:$4 sm:$0xff]   ;;  %v4499_v23 = vld [vmem:[#allocation5 + $0x590] ss:$28 sps:$4 sm:$0xff]  }
 0x108   :  { %2562 = vmatprep.subr.bf16.mxu1 %v4413_v24  ;;  %v4466_v24 = vld [vmem:[#allocation5 + $0x2e8] ss:$28 sps:$4 sm:$0xff]  }
 0x10a   :  { %2401 = vmatpush1.bf16.msra.mxu0 %v4408_v25  ;;  %v4473_v25 = vld [vmem:[#allocation5 + $0x324] ss:$28 sps:$4 sm:$0xff]  }
 0x10b   :  { %2563 = vmatpush1.bf16.msra.mxu1 %v4411_v26  ;;  %2616 = vmatprep.subr.bf16.mxu0 %v4420_v28  ;;  %v4500_v26 = vld [vmem:[#allocation5 + $0x3d0] ss:$28 sps:$4 sm:$0xff]   ;;  %v4504_v28 = vld [vmem:[#allocation5 + $0x5c8] ss:$28 sps:$4 sm:$0xff]  }
 0x10c   :  { %2564 = vmatprep.subr.bf16.mxu1 %v4417_v29  ;;  %v4471_v29 = vld [vmem:[#allocation5 + $0x320] ss:$28 sps:$4 sm:$0xff]  }
 0x10d   :  { %2403 = vmatmul.mubr.bf16.vlgmr.msra.gmra.mrb[0].mxu0 %v4909_v30 }
 0x10e   :  { %2617 = vmatpush1.bf16.msra.mxu0 %v4418_v32  ;;  %2648 = vmatprep.mubr.bf16.mxu0 %v4877_v55  ;;  %v4505_v32 = vld [vmem:[#allocation5 + $0x408] ss:$28 sps:$4 sm:$0xff]  }
 0x10f   :  { %2565 = vmatpush1.bf16.msra.mxu1 %v4415_v31  ;;  %2618 = vmatprep.subr.bf16.mxu0 %v4423_v33  ;;  %v4478_v31 = vld [vmem:[#allocation5 + $0x35c] ss:$28 sps:$4 sm:$0xff]  }
 0x110   :  { %2575 = vmatprep.subr.bf16.mxu1 %v4429_v34  ;;  %v4509_v33 = vld [vmem:[#allocation5 + $0x600] ss:$28 sps:$4 sm:$0xff]   ;;  %v4476_v34 = vld [vmem:[#allocation5 + $0x358] ss:$28 sps:$4 sm:$0xff]  }
 0x112   :  { %2567 = vmatmul.mubr.bf16.vlgmr.msra.gmra.mrb[4].mxu1 %v4909_v30  ;;  %2619 = vmatpush1.bf16.msra.mxu0 %v4421_v35  ;;  %v4483_v35 = vld [vmem:[#allocation5 + $0x394] ss:$28 sps:$4 sm:$0xff]  }
 0x113   :  { %2620 = vmatprep.subr.bf16.mxu0 %v4426_v36  ;;  %2576 = vmatpush1.bf16.msra.mxu1 %v4427_v37  ;;  %v4510_v36 = vld [vmem:[#allocation5 + $0x440] ss:$28 sps:$4 sm:$0xff]   ;;  %v4514_v37 = vld [vmem:[#allocation5 + $0x638] ss:$28 sps:$4 sm:$0xff]  }
 0x114   :  { %2607 = vmatprep.mubr.bf16.mxu1 %v4790_v0  ;;  %3926 = vmatprep.subr.bf16.mxu1 %v4454_v22  ;;  %v4481_v22 = vld [vmem:[#allocation5 + $0x390] ss:$28 sps:$4 sm:$0xff]  }
 0x116   :  { %2621 = vmatpush1.bf16.msra.mxu0 %v4424_v38  ;;  %v4488_v38 = vld [vmem:[#allocation5 + $0x3cc] ss:$28 sps:$4 sm:$0xff]  }
 0x117   :  { %2622 = vmatprep.subr.bf16.mxu0 %v4432_v39  ;;  %v4515_v39 = vld [vmem:[#allocation5 + $0x478] ss:$28 sps:$4 sm:$0xff]  }
 0x11a   :  { %2623 = vmatpush1.bf16.msra.mxu0 %v4430_v41  ;;  %v4519_v41 = vld [vmem:[#allocation5 + $0x670] ss:$28 sps:$4 sm:$0xff]  }
 0x11b   :  { %2624 = vmatprep.subr.bf16.mxu0 %v4435_v42  ;;  %v4486_v42 = vld [vmem:[#allocation5 + $0x3c8] ss:$28 sps:$4 sm:$0xff]  }
 0x11e   :  { %3872 = vmatmul.mubr.msk.bf16.vlgmr.msra.gmra.mrb[4].mxu1 %vm2284_vm0, %v4873_v10  ;;  %2625 = vmatpush1.bf16.msra.mxu0 %v4433_v43  ;;  %v4493_v43 = vld [vmem:[#allocation5 + $0x404] ss:$28 sps:$4 sm:$0xff]  }
 0x11f   :  { %2626 = vmatprep.subr.bf16.mxu0 %v4438_v44  ;;  %3927 = vmatpush3.bf16.msra.mxu1 %v4455_v45  ;;  %v4520_v44 = vld [vmem:[#allocation5 + $0x4b0] ss:$28 sps:$4 sm:$0xff]   ;;  %v4524_v45 = vld [vmem:[#allocation5 + $0x6a8] ss:$28 sps:$4 sm:$0xff]  }
 0x120   :  { %3928 = vmatprep.subr.bf16.mxu1 %v4459_v46  ;;  %2812 = vmatprep.mubr.bf16.mxu1 %v4877_v55  ;;  %v4474_v55 = vld [vmem:[#allocation5 + $0x2b8] ss:$28 sps:$4 sm:$0xff]   ;;  %v4491_v46 = vld [vmem:[#allocation5 + $0x400] ss:$28 sps:$4 sm:$0xff]  }
 0x122   :  { %2627 = vmatpush1.bf16.msra.mxu0 %v4436_v47  ;;  %v4498_v47 = vld [vmem:[#allocation5 + $0x43c] ss:$28 sps:$4 sm:$0xff]  }
 0x123   :  { %2628 = vmatprep.subr.bf16.mxu0 %v4441_v48  ;;  %3929 = vmatpush3.bf16.msra.mxu1 %v4460_v49  ;;  %v4525_v48 = vld [vmem:[#allocation5 + $0x4e8] ss:$28 sps:$4 sm:$0xff]   ;;  %v4529_v49 = vld [vmem:[#allocation5 + $0x6e0] ss:$28 sps:$4 sm:$0xff]  }
 0x124   :  { %3930 = vmatprep.subr.bf16.mxu1 %v4464_v50  ;;  %v4496_v50 = vld [vmem:[#allocation5 + $0x438] ss:$28 sps:$4 sm:$0xff]  }
 0x125   :  { %v4918_v58 = vpop.f32.mrb[0].mxu1 }
 0x126   :  { %2629 = vmatpush1.bf16.msra.mxu0 %v4439_v51  ;;  %v4920_v59 = vpop.f32.mrb[1].mxu1  ;;  %v4530_v51 = vld [vmem:[#allocation5 + $0x520] ss:$28 sps:$4 sm:$0xff]  }
 0x127   :  { %2630 = vmatprep.subr.bf16.mxu0 %v4444_v52  ;;  %3931 = vmatpush3.bf16.msra.mxu1 %v4465_v53  ;;  %v2449_v61 = vpop.f32.mrb[2].mxu1  ;;  %v4501_v52 = vld [vmem:[#allocation5 + $0x470] ss:$28 sps:$4 sm:$0xff]  }
 0x128   :  { %3932 = vmatprep.subr.bf16.mxu1 %v4469_v54  ;;  %v2450_v62 = vpop.f32.mrb[3].mxu1  ;;  %v4508_v53 = vld [vmem:[#allocation5 + $0x4ac] ss:$28 sps:$4 sm:$0xff]   ;;  %v4535_v54 = vld [vmem:[#allocation5 + $0x718] ss:$28 sps:$4 sm:$0xff]  }
 0x129   :  { %v4540_v61 = vld [vmem:[#allocation5 + $0x750] ss:$28 sps:$4 sm:$0xff]   ;;  %v4544_v62 = vld [vmem:[#allocation5 + $0x948] ss:$28 sps:$4 sm:$0xff]  }
 0x12a   :  { %2631 = vmatpush1.bf16.msra.mxu0 %v4442_v56  ;;  %v4539_v56 = vld [vmem:[#allocation5 + $0x910] ss:$28 sps:$4 sm:$0xff]  }
 0x12b   :  { %2632 = vmatprep.subr.bf16.mxu0 %v4447_v57  ;;  %3933 = vmatpush3.bf16.msra.mxu1 %v4470_v60  ;;  %v4506_v57 = vld [vmem:[#allocation5 + $0x4a8] ss:$28 sps:$4 sm:$0xff]  }
 0x12c   :  { %3934 = vmatprep.subr.bf16.mxu1 %v4474_v55  ;;  %v4513_v60 = vld [vmem:[#allocation5 + $0x4e4] ss:$28 sps:$4 sm:$0xff]  }
 0x12d   :  { %v4511_v55 = vld [vmem:[#allocation5 + $0x4e0] ss:$28 sps:$4 sm:$0xff]  }
 0x12e   :  { %2633 = vmatpush1.bf16.msra.mxu0 %v4445_v63  ;;  %v4518_v63 = vld [vmem:[#allocation5 + $0x51c] ss:$28 sps:$4 sm:$0xff]  }
 0x12f   :  { %2634 = vmatprep.subr.bf16.mxu0 %v4450_v1  ;;  %3935 = vmatpush3.bf16.msra.mxu1 %v4475_v2  ;;  %v4545_v1 = vld [vmem:[#allocation5 + $0x788] ss:$28 sps:$4 sm:$0xff]   ;;  %v4516_v2 = vld [vmem:[#allocation5 + $0x518] ss:$28 sps:$4 sm:$0xff]  }
 0x130   :  { %3936 = vmatprep.subr.bf16.mxu1 %v4479_v3  ;;  %v4549_v3 = vld [vmem:[#allocation5 + $0x980] ss:$28 sps:$4 sm:$0xff]  }
 0x132   :  { %2635 = vmatpush1.bf16.msra.mxu0 %v4448_v4  ;;  %v4523_v4 = vld [vmem:[#allocation5 + $0x554] ss:$28 sps:$4 sm:$0xff]  }
 0x133   :  { %2636 = vmatprep.subr.bf16.mxu0 %v4453_v5  ;;  %3937 = vmatpush3.bf16.msra.mxu1 %v4480_v6  ;;  %v4550_v5 = vld [vmem:[#allocation5 + $0x7c0] ss:$28 sps:$4 sm:$0xff]   ;;  %v4554_v6 = vld [vmem:[#allocation5 + $0x9b8] ss:$28 sps:$4 sm:$0xff]  }
 0x134   :  { %3938 = vmatprep.subr.bf16.mxu1 %v4484_v7  ;;  %v4521_v7 = vld [vmem:[#allocation5 + $0x550] ss:$28 sps:$4 sm:$0xff]  }
 0x136   :  { %2637 = vmatpush1.bf16.msra.mxu0 %v4451_v8  ;;  %v4528_v8 = vld [vmem:[#allocation5 + $0x58c] ss:$28 sps:$4 sm:$0xff]  }
 0x137   :  { %2638 = vmatprep.subr.bf16.mxu0 %v4458_v11  ;;  %3939 = vmatpush3.bf16.msra.mxu1 %v4485_v12  ;;  %v4555_v11 = vld [vmem:[#allocation5 + $0x7f8] ss:$28 sps:$4 sm:$0xff]   ;;  %v4559_v12 = vld [vmem:[#allocation5 + $0x9f0] ss:$28 sps:$4 sm:$0xff]  }
 0x138   :  { %3940 = vmatprep.subr.bf16.mxu1 %v4489_v13  ;;  %v4526_v13 = vld [vmem:[#allocation5 + $0x588] ss:$28 sps:$4 sm:$0xff]  }
 0x13a   :  { %2639 = vmatpush1.bf16.msra.mxu0 %v4456_v14  ;;  %v4533_v14 = vld [vmem:[#allocation5 + $0x5c4] ss:$28 sps:$4 sm:$0xff]  }
 0x13b   :  { %2640 = vmatprep.subr.bf16.mxu0 %v4463_v15  ;;  %3941 = vmatpush3.bf16.msra.mxu1 %v4490_v16  ;;  %v4560_v15 = vld [vmem:[#allocation5 + $0x830] ss:$28 sps:$4 sm:$0xff]   ;;  %v4564_v16 = vld [vmem:[#allocation5 + $0xa28] ss:$28 sps:$4 sm:$0xff]  }
 0x13c   :  { %3948 = vmatprep.subr.bf16.mxu1 %v4494_v17  ;;  %v4531_v17 = vld [vmem:[#allocation5 + $0x5c0] ss:$28 sps:$4 sm:$0xff]  }
 0x13e   :  { %2641 = vmatpush1.bf16.msra.mxu0 %v4461_v18  ;;  %2813 = vmatmul.mubr.bf16.vlgmr.msra.gmra.mrb[8].mxu1 %v4881_v9  ;;  %v4538_v18 = vld [vmem:[#allocation5 + $0x5fc] ss:$28 sps:$4 sm:$0xff]  }
 0x13f   :  { %2642 = vmatprep.subr.bf16.mxu0 %v4468_v20  ;;  %3949 = vmatpush3.bf16.msra.mxu1 %v4495_v21  ;;  %v4565_v20 = vld [vmem:[#allocation5 + $0x868] ss:$28 sps:$4 sm:$0xff]   ;;  %v4569_v21 = vld [vmem:[#allocation5 + $0xa60] ss:$28 sps:$4 sm:$0xff]  }
 0x140   :  { %3950 = vmatprep.subr.bf16.mxu1 %v4499_v23  ;;  %2852 = vmatprep.mubr.bf16.mxu1 %v4889_v40  ;;  %v4536_v23 = vld [vmem:[#allocation5 + $0x5f8] ss:$28 sps:$4 sm:$0xff]  }
 0x142   :  { %2643 = vmatpush1.bf16.msra.mxu0 %v4466_v24  ;;  %v4543_v24 = vld [vmem:[#allocation5 + $0x634] ss:$28 sps:$4 sm:$0xff]  }
 0x143   :  { %2644 = vmatprep.subr.bf16.mxu0 %v4473_v25  ;;  %3951 = vmatpush3.bf16.msra.mxu1 %v4500_v26  ;;  %v4570_v25 = vld [vmem:[#allocation5 + $0x8a0] ss:$28 sps:$4 sm:$0xff]   ;;  %v4541_v26 = vld [vmem:[#allocation5 + $0x630] ss:$28 sps:$4 sm:$0xff]  }
 0x144   :  { %3952 = vmatprep.subr.bf16.mxu1 %v4504_v28  ;;  %v4548_v28 = vld [vmem:[#allocation5 + $0x66c] ss:$28 sps:$4 sm:$0xff]  }
 0x146   :  { %2645 = vmatpush1.bf16.msra.mxu0 %v4471_v29  ;;  %v4577_v29 = vld [vmem:[#allocation5 + $0xa98] ss:$28 sps:$4 sm:$0xff]  }
 0x147   :  { %2646 = vmatprep.subr.bf16.mxu0 %v4478_v31  ;;  %3953 = vmatpush3.bf16.msra.mxu1 %v4505_v32  ;;  %v4791_v31 = vmov 0.0   ;;  %v4611_v32 = vld [vmem:[%s5126_s3 + $0x40] sm:$0xff]  }
 0x148   :  { %3954 = vmatprep.subr.bf16.mxu1 %v4509_v33  ;;  %v4546_v33 = vld [vmem:[#allocation5 + $0x668] ss:$28 sps:$4 sm:$0xff]  }
 0x14a   :  { %2647 = vmatpush1.bf16.msra.mxu0 %v4476_v34  ;;  %v4553_v34 = vld [vmem:[#allocation5 + $0x6a4] ss:$28 sps:$4 sm:$0xff]  }
 0x14b   :  { %2657 = vmatprep.subr.bf16.mxu0 %v4483_v35  ;;  %3955 = vmatpush3.bf16.msra.mxu1 %v4510_v36  ;;  %v4551_v35 = vld [vmem:[#allocation5 + $0x6a0] ss:$28 sps:$4 sm:$0xff]  }
 0x14c   :  { %3956 = vmatprep.subr.bf16.mxu1 %v4514_v37  ;;  %v4558_v36 = vld [vmem:[#allocation5 + $0x6dc] ss:$28 sps:$4 sm:$0xff]   ;;  %v4615_v37 = vld [vmem:[%s5126_s3] sm:$0xff]  }
 0x14d   :  { %2649 = vmatmul.mubr.bf16.vlgmr.msra.gmra.mrb[4].mxu0 %v4881_v9  ;;  %v4503_v9 = vld [vmem:[#allocation5 + $0x474] ss:$28 sps:$4 sm:$0xff]  }
 0x14e   :  { %2658 = vmatpush1.bf16.msra.mxu0 %v4481_v22  ;;  %2689 = vmatprep.mubr.bf16.mxu0 %v4889_v40  ;;  %v4534_v40 = vld [vmem:[#allocation5 + $0x8d8] ss:$28 sps:$4 sm:$0xff]   ;;  %v4616_v22 = vld [vmem:[%s5126_s3 + $0x48] sm:$0xff]  }
 0x14f   :  { %2659 = vmatprep.subr.bf16.mxu0 %v4488_v38  ;;  %3957 = vmatpush3.bf16.msra.mxu1 %v4515_v39  ;;  %v4556_v38 = vld [vmem:[#allocation5 + $0x6d8] ss:$28 sps:$4 sm:$0xff]  }
 0x150   :  { %3958 = vmatprep.subr.bf16.mxu1 %v4519_v41  ;;  %v4563_v39 = vld [vmem:[#allocation5 + $0x714] ss:$28 sps:$4 sm:$0xff]  }
 0x151   :  { %v4620_v41 = vld [vmem:[%s5126_s3 + $0x8] sm:$0xff]  }
 0x152   :  { %2660 = vmatpush1.bf16.msra.mxu0 %v4486_v42  ;;  %v4621_v42 = vld [vmem:[%s5126_s3 + $0x50] sm:$0xff]  }
 0x153   :  { %2661 = vmatprep.subr.bf16.mxu0 %v4493_v43  ;;  %3959 = vmatpush3.bf16.msra.mxu1 %v4520_v44  ;;  %v4561_v43 = vld [vmem:[#allocation5 + $0x710] ss:$28 sps:$4 sm:$0xff]  }
 0x154   :  { %3960 = vmatprep.subr.bf16.mxu1 %v4524_v45  ;;  %v4568_v44 = vld [vmem:[#allocation5 + $0x74c] ss:$28 sps:$4 sm:$0xff]   ;;  %v4622_v45 = vld [vmem:[%s5126_s3 + $0x10] sm:$0xff]  }
 0x156   :  { %2662 = vmatpush1.bf16.msra.mxu0 %v4491_v46  ;;  %v4623_v46 = vld [vmem:[%s5126_s3 + $0x58] sm:$0xff]  }
 0x157   :  { %2663 = vmatprep.subr.bf16.mxu0 %v4498_v47  ;;  %3961 = vmatpush3.bf16.msra.mxu1 %v4525_v48  ;;  %v4566_v47 = vld [vmem:[#allocation5 + $0x748] ss:$28 sps:$4 sm:$0xff]  }
 0x158   :  { %3962 = vmatprep.subr.bf16.mxu1 %v4529_v49  ;;  %v4573_v48 = vld [vmem:[#allocation5 + $0x784] ss:$28 sps:$4 sm:$0xff]  }
 0x159   :  { %v4624_v49 = vld [vmem:[%s5126_s3 + $0x18] sm:$0xff]  }
 0x15a   :  { %2664 = vmatpush1.bf16.msra.mxu0 %v4496_v50  ;;  %v4625_v50 = vld [vmem:[%s5126_s3 + $0x60] sm:$0xff]  }
 0x15b   :  { %2665 = vmatprep.subr.bf16.mxu0 %v4503_v9  ;;  %3963 = vmatpush3.bf16.msra.mxu1 %v4530_v51  ;;  %v4571_v9 = vld [vmem:[#allocation5 + $0x780] ss:$28 sps:$4 sm:$0xff]   ;;  %v4627_v51 = vld [vmem:[%s5126_s3 + $0x68] sm:$0xff]  }
 0x15c   :  { %3970 = vmatprep.subr.bf16.mxu1 %v4534_v40  ;;  %v4574_v40 = vld [vmem:[#allocation5 + $0x7b8] ss:$28 sps:$4 sm:$0xff]  }
 0x15e   :  { %2666 = vmatpush1.bf16.msra.mxu0 %v4501_v52  ;;  %2853 = vmatmul.mubr.bf16.vlgmr.msra.gmra.mrb[12].mxu1 %v4895_v19  ;;  %v4580_v52 = vld [vmem:[#allocation5 + $0x7f4] ss:$28 sps:$4 sm:$0xff]  }
 0x15f   :  { %2667 = vmatprep.subr.bf16.mxu0 %v4508_v53  ;;  %3971 = vmatpush3.bf16.msra.mxu1 %v4535_v54  ;;  %v4628_v53 = vld [vmem:[%s5126_s3 + $0x28] sm:$0xff]   ;;  %v4629_v54 = vld [vmem:[%s5126_s3 + $0x70] sm:$0xff]  }
 0x160   :  { %3972 = vmatprep.subr.bf16.mxu1 %v4539_v56  ;;  %2892 = vmatprep.mubr.bf16.mxu1 %v4902_v27  ;;  %v4578_v56 = vld [vmem:[#allocation5 + $0x7f0] ss:$28 sps:$4 sm:$0xff]  }
 0x162   :  { %2668 = vmatpush1.bf16.msra.mxu0 %v4506_v57  ;;  %v4583_v57 = vld [vmem:[#allocation5 + $0x82c] ss:$28 sps:$4 sm:$0xff]  }
 0x163   :  { %2669 = vmatprep.subr.bf16.mxu0 %v4513_v60  ;;  %3973 = vmatpush3.bf16.msra.mxu1 %v4540_v61  ;;  %v4630_v60 = vld [vmem:[%s5126_s3 + $0x30] sm:$0xff]   ;;  %v4631_v61 = vld [vmem:[%s5126_s3 + $0x78] sm:$0xff]  }
 0x164   :  { %3974 = vmatprep.subr.bf16.mxu1 %v4544_v62  ;;  %v4586_v62 = vld [vmem:[#allocation5 + $0x864] ss:$28 sps:$4 sm:$0xff]  }
 0x166   :  { %2670 = vmatpush1.bf16.msra.mxu0 %v4511_v55  ;;  %v4581_v55 = vld [vmem:[#allocation5 + $0x828] ss:$28 sps:$4 sm:$0xff]  }
 0x167   :  { %2671 = vmatprep.subr.bf16.mxu0 %v4518_v63  ;;  %3975 = vmatpush3.bf16.msra.mxu1 %v4545_v1  ;;  %v4632_v63 = vld [vmem:[%s5126_s3 + $0x38] sm:$0xff]   ;;  %v4633_v1 = vld [vmem:[%s5126_s3 + $0xc0] sm:$0xff]  }
 0x168   :  { %3976 = vmatprep.subr.bf16.mxu1 %v4549_v3  ;;  %v4589_v3 = vld [vmem:[#allocation5 + $0x89c] ss:$28 sps:$4 sm:$0xff]  }
 0x16a   :  { %2672 = vmatpush1.bf16.msra.mxu0 %v4516_v2  ;;  %v4584_v2 = vld [vmem:[#allocation5 + $0x860] ss:$28 sps:$4 sm:$0xff]  }
 0x16b   :  { %2673 = vmatprep.subr.bf16.mxu0 %v4523_v4  ;;  %3977 = vmatpush3.bf16.msra.mxu1 %v4550_v5  ;;  %v4587_v4 = vld [vmem:[#allocation5 + $0x898] ss:$28 sps:$4 sm:$0xff]  }
 0x16c   :  { %3978 = vmatprep.subr.bf16.mxu1 %v4554_v6  ;;  %v4592_v5 = vld [vmem:[#allocation5 + $0x8d4] ss:$28 sps:$4 sm:$0xff]  }
 0x16d   :  { %v4590_v6 = vld [vmem:[#allocation5 + $0x8d0] ss:$28 sps:$4 sm:$0xff]  }
 0x16e   :  { %2674 = vmatpush1.bf16.msra.mxu0 %v4521_v7  ;;  %v4595_v7 = vld [vmem:[#allocation5 + $0x90c] ss:$28 sps:$4 sm:$0xff]  }
 0x16f   :  { %2675 = vmatprep.subr.bf16.mxu0 %v4528_v8  ;;  %3979 = vmatpush3.bf16.msra.mxu1 %v4555_v11  ;;  %v4593_v8 = vld [vmem:[#allocation5 + $0x908] ss:$28 sps:$4 sm:$0xff]  }
 0x170   :  { %3980 = vmatprep.subr.bf16.mxu1 %v4559_v12  ;;  %v4598_v11 = vld [vmem:[#allocation5 + $0x944] ss:$28 sps:$4 sm:$0xff]  }
 0x171   :  { %v4596_v12 = vld [vmem:[#allocation5 + $0x940] ss:$28 sps:$4 sm:$0xff]  }
 0x172   :  { %2676 = vmatpush1.bf16.msra.mxu0 %v4526_v13  ;;  %v4601_v13 = vld [vmem:[#allocation5 + $0x97c] ss:$28 sps:$4 sm:$0xff]  }
 0x173   :  { %2677 = vmatprep.subr.bf16.mxu0 %v4533_v14  ;;  %3981 = vmatpush3.bf16.msra.mxu1 %v4560_v15  ;;  %v4599_v14 = vld [vmem:[#allocation5 + $0x978] ss:$28 sps:$4 sm:$0xff]  }
 0x174   :  { %3982 = vmatprep.subr.bf16.mxu1 %v4564_v16  ;;  %v4604_v15 = vld [vmem:[#allocation5 + $0x9b4] ss:$28 sps:$4 sm:$0xff]  }
 0x175   :  { %v4602_v16 = vld [vmem:[#allocation5 + $0x9b0] ss:$28 sps:$4 sm:$0xff]  }
 0x176   :  { %2678 = vmatpush1.bf16.msra.mxu0 %v4531_v17  ;;  %v4607_v17 = vld [vmem:[#allocation5 + $0x9ec] ss:$28 sps:$4 sm:$0xff]  }
 0x177   :  { %2679 = vmatprep.subr.bf16.mxu0 %v4538_v18  ;;  %3983 = vmatpush3.bf16.msra.mxu1 %v4565_v20  ;;  %v4605_v18 = vld [vmem:[#allocation5 + $0x9e8] ss:$28 sps:$4 sm:$0xff]  }
 0x178   :  { %3984 = vmatprep.subr.bf16.mxu1 %v4569_v21  ;;  %v4610_v20 = vld [vmem:[#allocation5 + $0xa24] ss:$28 sps:$4 sm:$0xff]  }
 0x179   :  { %v4608_v21 = vld [vmem:[#allocation5 + $0xa20] ss:$28 sps:$4 sm:$0xff]  }
 0x17a   :  { %2680 = vmatpush1.bf16.msra.mxu0 %v4536_v23  ;;  %v4614_v23 = vld [vmem:[#allocation5 + $0xa5c] ss:$28 sps:$4 sm:$0xff]  }
 0x17b   :  { %2681 = vmatprep.subr.bf16.mxu0 %v4543_v24  ;;  %3985 = vmatpush3.bf16.msra.mxu1 %v4570_v25  ;;  %v4612_v24 = vld [vmem:[#allocation5 + $0xa58] ss:$28 sps:$4 sm:$0xff]  }
 0x17c   :  { %4062 = vmatprep.subr.bf16.mxu1 %v4791_v31  ;;  %v4619_v25 = vld [vmem:[#allocation5 + $0xa94] ss:$28 sps:$4 sm:$0xff]  }
 0x17e   :  { %2682 = vmatpush1.bf16.msra.mxu0 %v4541_v26  ;;  %2893 = vmatmul.mubr.bf16.vlgmr.msra.gmra.mrb[16].mxu1 %v4909_v30  ;;  %v4617_v26 = vld [vmem:[#allocation5 + $0xa90] ss:$28 sps:$4 sm:$0xff]  }
 0x17f   :  { %2683 = vmatprep.subr.bf16.mxu0 %v4548_v28  ;;  %4063 = vmatpush3.bf16.msra.mxu1 %v4577_v29  ;;  %v485_v28 = vlaneseq }
 0x180   :  { %4064 = vmatprep.mubr.msk.bf16.mxu1 %vm4792_vm1, %v4791_v31  ;;  %3994 = vmatprep.subr.bf16.mxu1 %v4611_v32 }
 0x181   :  { %v4990_v29 = vshrl.u32 %v485_v28, 7  ;;  %v4663_v28 = vld [vmem:[%s5126_s3 + $0x130] sm:$0xff]  }
 0x182   :  { %2684 = vmatpush1.bf16.msra.mxu0 %v4546_v33  ;;  %v4995_v33 = vld [vmem:[#allocation7] sm:$0x7f] }
 0x183   :  { %2685 = vmatprep.subr.bf16.mxu0 %v4553_v34  ;;  %v487_v32 = vsub.s32 0, %v4990_v29  ;;  %v491_v34 = vsub.s32 1, %v4990_v29 }
 0x186   :  { %2686 = vmatpush1.bf16.msra.mxu0 %v4551_v35  ;;  %4065 = vmatmul.mubr.msk.bf16.vlgmr.msra.gmra.mrb[20].mxu1 %vm2284_vm0, %v4873_v10  ;;  %v492_v35 = vrot.slane %v4995_v33, %v491_v34  ;;  %v4664_v34 = vld [vmem:[%s5126_s3 + $0x178] sm:$0xff]  }
 0x187   :  { %2687 = vmatprep.subr.bf16.mxu0 %v4558_v36  ;;  %3995 = vmatpush3.bf16.msra.mxu1 %v4615_v37 }
 0x188   :  { %3996 = vmatprep.subr.bf16.mxu1 %v4616_v22 }
 0x18a   :  { %2688 = vmatpush1.bf16.msra.mxu0 %v4556_v38 }
 0x18b   :  { %2698 = vmatprep.subr.bf16.mxu0 %v4563_v39  ;;  %3997 = vmatpush3.bf16.msra.mxu1 %v4620_v41 }
 0x18c   :  { %3998 = vmatprep.subr.bf16.mxu1 %v4621_v42 }
 0x18d   :  { %2690 = vmatmul.mubr.bf16.vlgmr.msra.gmra.mrb[4].mxu0 %v4895_v19  ;;  %v4576_v19 = vld [vmem:[#allocation5 + $0x7bc] ss:$28 sps:$4 sm:$0xff]  }
 0x18e   :  { %2699 = vmatpush1.bf16.msra.mxu0 %v4561_v43  ;;  %2730 = vmatprep.mubr.bf16.mxu0 %v4902_v27  ;;  %v4626_v27 = vld [vmem:[%s5126_s3 + $0x20] sm:$0xff]  }
 0x18f   :  { %2700 = vmatprep.subr.bf16.mxu0 %v4568_v44  ;;  %3999 = vmatpush3.bf16.msra.mxu1 %v4622_v45  ;;  %v4634_v43 = vld [vmem:[%s5126_s3 + $0x80] sm:$0xff]   ;;  %v4635_v45 = vld [vmem:[%s5126_s3 + $0xc8] sm:$0xff]  }
 0x190   :  { %4000 = vmatprep.subr.bf16.mxu1 %v4623_v46  ;;  %v499_v46 = vsub.s32 3, %v4990_v29 }
 0x192   :  { %2701 = vmatpush1.bf16.msra.mxu0 %v4566_v47  ;;  %v4638_v47 = vld [vmem:[%s5126_s3 + $0x90] sm:$0xff]  }
 0x193   :  { %2702 = vmatprep.subr.bf16.mxu0 %v4573_v48  ;;  %4001 = vmatpush3.bf16.msra.mxu1 %v4624_v49  ;;  %v500_v48 = vrot.slane %v4995_v33, %v499_v46  ;;  %v4639_v49 = vld [vmem:[%s5126_s3 + $0xd8] sm:$0xff]  }
 0x194   :  { %4002 = vmatprep.subr.bf16.mxu1 %v4625_v50 }
 0x196   :  { %2703 = vmatpush1.bf16.msra.mxu0 %v4571_v9 }
 0x197   :  { %2704 = vmatprep.subr.bf16.mxu0 %v4576_v19  ;;  %4003 = vmatpush3.bf16.msra.mxu1 %v4626_v27  ;;  %v4640_v19 = vld [vmem:[%s5126_s3 + $0x98] sm:$0xff]  }
 0x198   :  { %4004 = vmatprep.subr.bf16.mxu1 %v4627_v51 }
 0x19a   :  { %2705 = vmatpush1.bf16.msra.mxu0 %v4574_v40  ;;  %v4641_v40 = vld [vmem:[%s5126_s3 + $0xe0] sm:$0xff]  }
 0x19b   :  { %2706 = vmatprep.subr.bf16.mxu0 %v4580_v52  ;;  %4005 = vmatpush3.bf16.msra.mxu1 %v4628_v53 }
 0x19c   :  { %4006 = vmatprep.subr.bf16.mxu1 %v4629_v54  ;;  %v4642_v54 = vld [vmem:[%s5126_s3 + $0xa0] sm:$0xff]  }
 0x19e   :  { %2707 = vmatpush1.bf16.msra.mxu0 %v4578_v56  ;;  %v4643_v56 = vld [vmem:[%s5126_s3 + $0xe8] sm:$0xff]  }
 0x19f   :  { %2708 = vmatprep.subr.bf16.mxu0 %v4583_v57  ;;  %4007 = vmatpush3.bf16.msra.mxu1 %v4630_v60  ;;  %v4644_v57 = vld [vmem:[%s5126_s3 + $0xa8] sm:$0xff]   ;;  %v495_v60 = vsub.s32 2, %v4990_v29 }
 0x1a0   :  { %4008 = vmatprep.subr.bf16.mxu1 %v4631_v61  ;;  %v4645_v61 = vld [vmem:[%s5126_s3 + $0xf0] sm:$0xff]  }
 0x1a2   :  { %2709 = vmatpush1.bf16.msra.mxu0 %v4581_v55  ;;  %v4646_v55 = vld [vmem:[%s5126_s3 + $0xb0] sm:$0xff]  }
 0x1a3   :  { %2710 = vmatprep.subr.bf16.mxu0 %v4586_v62  ;;  %4009 = vmatpush3.bf16.msra.mxu1 %v4632_v63  ;;  %v496_v62 = vrot.slane %v4995_v33, %v495_v60  ;;  %v4647_v63 = vld [vmem:[%s5126_s3 + $0xf8] sm:$0xff]  }
 0x1a4   :  { %4016 = vmatprep.subr.bf16.mxu1 %v4633_v1  ;;  %v4648_v1 = vld [vmem:[%s5126_s3 + $0xb8] sm:$0xff]  }
 0x1a6   :  { %2711 = vmatpush1.bf16.msra.mxu0 %v4584_v2 }
 0x1a7   :  { %2712 = vmatprep.subr.bf16.mxu0 %v4589_v3  ;;  %v4650_v3 = vld [vmem:[%s5126_s3 + $0x140] sm:$0xff]  }
 0x1aa   :  { %2713 = vmatpush1.bf16.msra.mxu0 %v4587_v4  ;;  %v4651_v4 = vld [vmem:[%s5126_s3 + $0x100] sm:$0xff]  }
 0x1ab   :  { %2714 = vmatprep.subr.bf16.mxu0 %v4592_v5 }
 0x1ae   :  { %2715 = vmatpush1.bf16.msra.mxu0 %v4590_v6  ;;  %v4652_v6 = vld [vmem:[%s5126_s3 + $0x148] sm:$0xff]  }
 0x1af   :  { %2716 = vmatprep.subr.bf16.mxu0 %v4595_v7  ;;  %v4653_v7 = vld [vmem:[%s5126_s3 + $0x108] sm:$0xff]  }
 0x1b2   :  { %2717 = vmatpush1.bf16.msra.mxu0 %v4593_v8  ;;  %v4654_v8 = vld [vmem:[%s5126_s3 + $0x150] sm:$0xff]  }
 0x1b3   :  { %2718 = vmatprep.subr.bf16.mxu0 %v4598_v11  ;;  %v4655_v11 = vld [vmem:[%s5126_s3 + $0x110] sm:$0xff]  }
 0x1b6   :  { %2719 = vmatpush1.bf16.msra.mxu0 %v4596_v12  ;;  %v4656_v12 = vld [vmem:[%s5126_s3 + $0x158] sm:$0xff]  }
 0x1b7   :  { %2720 = vmatprep.subr.bf16.mxu0 %v4601_v13 }
 0x1ba   :  { %2721 = vmatpush1.bf16.msra.mxu0 %v4599_v14 }
 0x1bb   :  { %2722 = vmatprep.subr.bf16.mxu0 %v4604_v15  ;;  %v4657_v15 = vld [vmem:[%s5126_s3 + $0x118] sm:$0xff]  }
 0x1be   :  { %2723 = vmatpush1.bf16.msra.mxu0 %v4602_v16 }
 0x1bf   :  { %2724 = vmatprep.subr.bf16.mxu0 %v4607_v17 }
 0x1c2   :  { %2725 = vmatpush1.bf16.msra.mxu0 %v4605_v18  ;;  %v4658_v18 = vld [vmem:[%s5126_s3 + $0x160] sm:$0xff]  }
 0x1c3   :  { %2726 = vmatprep.subr.bf16.mxu0 %v4610_v20 }
 0x1c6   :  { %2727 = vmatpush1.bf16.msra.mxu0 %v4608_v21  ;;  %v4659_v21 = vld [vmem:[%s5126_s3 + $0x120] sm:$0xff]  }
 0x1c7   :  { %2728 = vmatprep.subr.bf16.mxu0 %v4614_v23  ;;  %v4660_v23 = vld [vmem:[%s5126_s3 + $0x168] sm:$0xff]  }
 0x1ca   :  { %2729 = vmatpush1.bf16.msra.mxu0 %v4612_v24  ;;  %v4661_v24 = vld [vmem:[%s5126_s3 + $0x128] sm:$0xff]  }
 0x1cb   :  { %2739 = vmatprep.subr.bf16.mxu0 %v4619_v25  ;;  %v4662_v25 = vld [vmem:[%s5126_s3 + $0x170] sm:$0xff]  }
 0x1cd   :  { %2731 = vmatmul.mubr.bf16.vlgmr.msra.gmra.mrb[4].mxu0 %v4909_v30  ;;  %v488_v30 = vrot.slane %v4995_v33, %v487_v32 }
 0x1ce   :  { %2740 = vmatpush1.bf16.msra.mxu0 %v4617_v26  ;;  %2771 = vmatprep.mubr.bf16.mxu0 %v4790_v0  ;;  %v4649_v0 = vld [vmem:[%s5126_s3 + $0x180] sm:$0xff]   ;;  %v511_v26 = vsub.s32 6, %v4990_v29 }
 0x1cf   :  { %4068 = vmatprep.subr.bf16.mxu0 %v4791_v31 }
 0x1d0   :  { %v512_v32 = vrot.slane %v4995_v33, %v511_v26 }
 0x1d9   :  { %3873 = vmatmul.mubr.msk.bf16.vlgmr.msra.gmra.mrb[4].mxu0 %vm2284_vm0, %v4873_v10 }
 0x1da   :  { %4070 = vmatprep.mubr.msk.bf16.mxu0 %vm4792_vm1, %v4791_v31  ;;  %4069 = vmatpush3.bf16.msra.mxu0 %v4649_v0  ;;  %v4665_v0 = vld [vmem:[%s5126_s3 + $0x138] sm:$0xff]  }
 0x1e0   :  { %v2404_v36 = vpop.f32.mrb[0].mxu0 }
 0x1e1   :  { %v4074_v10 = vadd.f32 %v2404_v36, %v488_v30  ;;  %v2406_v37 = vpop.f32.mrb[1].mxu0 }
 0x1e2   :  { %v4076_v22 = vadd.f32 %v2406_v37, %v492_v35  ;;  %v2408_v38 = vpop.f32.mrb[2].mxu0 }
 0x1e3   :  { %v4075_v39 = vadd.f32 %v4074_v10, %v4918_v58  ;;  %v2409_v41 = vpop.f32.mrb[3].mxu0  ;;  %v4636_v58 = vld [vmem:[%s5126_s3 + $0x88] sm:$0xff]  }
 0x1e4   :  { %v4077_v42 = vadd.f32 %v4076_v22, %v4920_v59  ;;  %v4637_v59 = vld [vmem:[%s5126_s3 + $0xd0] sm:$0xff]   ;;  %s4793_s3 = smov [#allocation10]  }
 0x1e5   :  { %v2940_v44 = vpack.c.bf16 %v4075_v39, %v4075_v39  ;;  %s3517_s26 = sshll.u32 %s4793_s3, 4  ;;  %s3518_s26 = int_to_ptr.vmem [resolvable:$true] %s3517_s26 }
 0x1e6   :  { %v2941_v31 = vpack.c.bf16 %v4077_v42, %v4077_v42  ;;  %s4754_s27 = scalar_lea.vmem %s3518_s26, 64  ;;  %p4759_p5 = scmp.lt.s32.totalorder %s3518_s26, %s3518_s26 }
 0x1e7   :  { %p4755_p4 = scmp.ne.s32.totalorder %s3518_s26, %s4754_s27  ;;  %p4760_p6 = scmp.lt.s32.totalorder %s4754_s27, %s4754_s27 }
 0x1e8   :  { %3381 = vmatprep.mubr.bf16.mxu1 %v2941_v31 }
 0x1e9   :  { %3382 = vmatmul.mubr.bf16.vlgmr.msra.gmra.mrb[24].mxu1 %v2940_v44  ;;  %p4761_p7 = por %p4760_p6, %p4759_p5 }
 0x1ea   :  { %4017 = vmatpush3.bf16.msra.mxu1 %v4634_v43 }
 0x1eb   :  { %4018 = vmatprep.subr.bf16.mxu1 %v4635_v45  ;;  %p4762_p8 = pnand %p4761_p7, %p4755_p4 }
 0x1ee   :  { %4019 = vmatpush3.bf16.msra.mxu1 %v4636_v58 }
 0x1ef   :  { %4020 = vmatprep.subr.bf16.mxu1 %v4637_v59 }
 0x1f1   :  { %v2609_v50 = vpop.f32.mrb[4].mxu1 }
 0x1f2   :  { %v2611_v9 = vpop.f32.mrb[5].mxu1  ;;  %4021 = vmatpush3.bf16.msra.mxu1 %v4638_v47  ;;  %v4078_v2 = vadd.f32 %v2609_v50, %v496_v62  ;;  %v507_v50 = vsub.s32 5, %v4990_v29 }
 0x1f3   :  { %v4079_v27 = vadd.f32 %v2611_v9, %v500_v48  ;;  %v2613_v51 = vpop.f32.mrb[6].mxu1  ;;  %4022 = vmatprep.subr.bf16.mxu1 %v4639_v49  ;;  %v503_v49 = vsub.s32 4, %v4990_v29  ;;  %v3875_v29 = vld [vmem:[#allocation8] ss:$0 sm:$0xff] }
 0x1f4   :  { %v2614_v52 = vpop.f32.mrb[7].mxu1  ;;  %v2942_v5 = vpack.c.bf16 %v4078_v2, %v4078_v2 }
 0x1f5   :  { %v2943_v53 = vpack.c.bf16 %v4079_v27, %v4079_v27  ;;  %v504_v9 = vrot.slane %v4995_v33, %v503_v49 }
 0x1f6   :  { %4023 = vmatpush3.bf16.msra.mxu1 %v4640_v19  ;;  %v508_v19 = vrot.slane %v4995_v33, %v507_v50 }
 0x1f7   :  { %3421 = vmatprep.mubr.bf16.mxu1 %v2943_v53  ;;  %4024 = vmatprep.subr.bf16.mxu1 %v4641_v40 }
 0x1fa   :  { %4025 = vmatpush3.bf16.msra.mxu1 %v4642_v54 }
 0x1fb   :  { %4026 = vmatprep.subr.bf16.mxu1 %v4643_v56 }
 0x1fe   :  { %4027 = vmatpush3.bf16.msra.mxu1 %v4644_v57 }
 0x1ff   :  { %4028 = vmatprep.subr.bf16.mxu1 %v4645_v61 }
 0x202   :  { %4029 = vmatpush3.bf16.msra.mxu1 %v4646_v55 }
 0x203   :  { %4030 = vmatprep.subr.bf16.mxu1 %v4647_v63 }
 0x206   :  { %4031 = vmatpush3.bf16.msra.mxu1 %v4648_v1 }
 0x207   :  { %4038 = vmatprep.subr.bf16.mxu1 %v4650_v3 }
 0x209   :  { %3422 = vmatmul.mubr.bf16.vlgmr.msra.gmra.mrb[28].mxu1 %v2942_v5 }
 0x20a   :  { %4039 = vmatpush3.bf16.msra.mxu1 %v4651_v4 }
 0x20b   :  { %4040 = vmatprep.subr.bf16.mxu1 %v4652_v6 }
 0x20e   :  { %4041 = vmatpush3.bf16.msra.mxu1 %v4653_v7 }
 0x20f   :  { %4042 = vmatprep.subr.bf16.mxu1 %v4654_v8 }
 0x211   :  { %v3942_v13 = vpop.f32.mrb[8].mxu1 }
 0x212   :  { %v3943_v14 = vpop.f32.mrb[9].mxu1  ;;  %4043 = vmatpush3.bf16.msra.mxu1 %v4655_v11 }
 0x213   :  { %v3944_v16 = vadd.f32 %v3943_v14, %v3942_v13  ;;  %v3945_v17 = vpop.f32.mrb[10].mxu1  ;;  %4044 = vmatprep.subr.bf16.mxu1 %v4656_v12 }
 0x214   :  { %v3946_v20 = vpop.f32.mrb[11].mxu1 }
 0x215   :  { %v2815_v30 = vadd.f32 %v3944_v16, %v512_v32 }
 0x216   :  { %4045 = vmatpush3.bf16.msra.mxu1 %v4657_v15 }
 0x217   :  { %4046 = vmatprep.subr.bf16.mxu1 %v4658_v18 }
 0x21a   :  { %4047 = vmatpush3.bf16.msra.mxu1 %v4659_v21 }
 0x21b   :  { %4048 = vmatprep.subr.bf16.mxu1 %v4660_v23 }
 0x21e   :  { %4049 = vmatpush3.bf16.msra.mxu1 %v4661_v24 }
 0x21f   :  { %4050 = vmatprep.subr.bf16.mxu1 %v4662_v25 }
 0x222   :  { %4051 = vmatpush3.bf16.msra.mxu1 %v4663_v28 }
 0x223   :  { %4052 = vmatprep.subr.bf16.mxu1 %v4664_v34 }
 0x226   :  { %4053 = vmatpush3.bf16.msra.mxu1 %v4665_v0 }
 0x231   :  { %v3964_v35 = vpop.f32.mrb[12].mxu1 }
 0x232   :  { %v3965_v36 = vpop.f32.mrb[13].mxu1 }
 0x233   :  { %v3966_v10 = vadd.f32 %v3965_v36, %v3964_v35  ;;  %v3967_v37 = vpop.f32.mrb[14].mxu1 }
 0x234   :  { %v3968_v22 = vpop.f32.mrb[15].mxu1 }
 0x235   :  { %v2855_v38 = vadd.f32 %v3966_v10, %v2815_v30 }
 0x251   :  { %v3986_v39 = vpop.f32.mrb[16].mxu1 }
 0x252   :  { %v3987_v41 = vpop.f32.mrb[17].mxu1 }
 0x253   :  { %v3988_v42 = vadd.f32 %v3987_v41, %v3986_v39  ;;  %v3989_v31 = vpop.f32.mrb[18].mxu1 }
 0x254   :  { %v3990_v43 = vpop.f32.mrb[19].mxu1 }
 0x255   :  { %v2895_v44 = vadd.f32 %v3988_v42, %v2855_v38 }
 0x259   :  { %v2934_v45 = vpop.f32.mrb[20].mxu1 }
 0x25a   :  { %v2935_v58 = vadd.f32 %v2934_v45, %v2895_v44  ;;  %v4066_v59 = vpop.f32.mrb[21].mxu1 }
 0x25b   :  { %v2937_v46 = vpop.f32.mrb[22].mxu1 }
 0x25c   :  { %v2946_v47 = vpack.c.bf16 %v2935_v58, %v2935_v58  ;;  %v4067_v48 = vpop.f32.mrb[23].mxu1 }
 0x25e   :  { %4071 = vmatmul.mubr.msk.bf16.vlgmr.msra.gmra.mrb[8].mxu0 %vm2284_vm0, %v2946_v47 }
 0x2ac   :  { %v2773_v27 = vpop.f32.mrb[4].mxu0 }
 0x2ad   :  { %v4080_v51 = vadd.f32 %v2773_v27, %v504_v9  ;;  %v2775_v40 = vpop.f32.mrb[5].mxu0 }
 0x2ae   :  { %v4081_v52 = vadd.f32 %v2775_v40, %v508_v19  ;;  %v2777_v53 = vpop.f32.mrb[6].mxu0 }
 0x2af   :  { %v2778_v54 = vpop.f32.mrb[7].mxu0  ;;  %v2944_v57 = vpack.c.bf16 %v4080_v51, %v4080_v51 }
 0x2b0   :  { %v2945_v56 = vpack.c.bf16 %v4081_v52, %v4081_v52 }
 0x2b2   :  { %3461 = vmatprep.mubr.bf16.mxu1 %v2945_v56 }
 0x2b3   :  { %3462 = vmatmul.mubr.bf16.vlgmr.msra.gmra.mrb[32].mxu1 %v2944_v57 }
 0x2bc   :  { %v4010_v60 = vpop.f32.mrb[24].mxu1 }
 0x2bd   :  { %v4011_v61 = vpop.f32.mrb[25].mxu1 }
 0x2be   :  { %v4012_v55 = vadd.f32 %v4011_v61, %v4010_v60  ;;  %v4013_v62 = vpop.f32.mrb[26].mxu1 }
 0x2bf   :  { %v4014_v63 = vpop.f32.mrb[27].mxu1 }
 0x2c0   :  { %v3384_v3 = vadd.f32 %v4012_v55, %v3875_v29 }
 0x2dc   :  { %v4032_v1 = vpop.f32.mrb[28].mxu1 }
 0x2dd   :  { %v4033_v2 = vpop.f32.mrb[29].mxu1 }
 0x2de   :  { %v4034_v33 = vadd.f32 %v4033_v2, %v4032_v1  ;;  %v4035_v4 = vpop.f32.mrb[30].mxu1 }
 0x2df   :  { %v4036_v5 = vpop.f32.mrb[31].mxu1 }
 0x2e0   :  { %v3424_v6 = vadd.f32 %v4034_v33, %v3384_v3 }
 0x331   :  { %v3503_v7 = vpop.f32.mrb[8].mxu0 }
 0x332   :  { %v4072_v8 = vpop.f32.mrb[9].mxu0 }
 0x333   :  { %v3506_v11 = vpop.f32.mrb[10].mxu0 }
 0x334   :  { %v4073_v12 = vpop.f32.mrb[11].mxu0 }
 0x386   :  { %v4054_v13 = vpop.f32.mrb[32].mxu1 }
 0x387   :  { %v4055_v14 = vpop.f32.mrb[33].mxu1 }
 0x388   :  { %v4056_v15 = vadd.f32 %v4055_v14, %v4054_v13  ;;  %v4057_v16 = vpop.f32.mrb[34].mxu1 }
 0x389   :  { %v4058_v17 = vpop.f32.mrb[35].mxu1 }
 0x38a   :  { %v3464_v18 = vadd.f32 %v4056_v15, %v3424_v6 }
 0x38c   :  { %v3504_v20 = vadd.f32 %v3503_v7, %v3464_v18 }
 0x38e   :  { %3510 = vst.msk [vmem:[#allocation10] sm:$0xf] %vm3509_vm2, %v3504_v20 }
 0x38f   :  { %4765 = shalt.err (!%p4762_p8)
}
 0x390   :  { %s4766_s29 = scalar_lea.hbm %s5128_s5, 64 }
 0x391   :  { %p4767_p9 = scmp.ne.s32.totalorder %s5128_s5, %s4766_s29  ;;  %p4770_p10 = scmp.lt.u32.totalorder %s4766_s29, %s5128_s5 }
 0x393   :  { %p4772_p11 = pnand %p4770_p10, %p4767_p9 }
 0x395   :  { %4775 = shalt.err (!%p4772_p11)
}
 0x396   :  { %3520 = dma.vmem_to_hbm [thread:$0]  %s3518_s26, 64, %s5128_s5, [#allocation4]  }
 0x397   :  { %4782 = dma.done.wait [#allocation4], 64  }
 0x398   :  { %4783 = vsyncadd [#allocation4], 4294967232 }
 0x399   :  { %3524 = vsyncpa [#allocation3], 1 }
 0x39a   :  { %3525 = vsyncpa [#allocation6], 1 }
 0x39b   :  { %3526 = vsyncpa [#allocation9], 1 }
 0x39c   :  { %3527 = vsyncpa [#allocation4], 1 }

</bundles_post_ra>
